<compile_context>
chip_gen: v7x
topology: tpu7x:2x2x1
jax: 0.10.0
libtpu: 0.0.40
codegen_flags: <defaults>
</compile_context>

<pallas_src>
import math

import jax
import jax.numpy as jnp
from jax.experimental import pallas as pl
from jax.experimental.pallas import tpu as pltpu

# ------------------------- config -------------------------
BATCH = 2
SEQ = 8
EMBED = 32
NUM_HEADS = 4
DIM_HEAD = EMBED // NUM_HEADS                      # 8
NB_FEATURES = int(DIM_HEAD * math.log(DIM_HEAD))   # 16
HM = NUM_HEADS * NB_FEATURES                       # 64  (all heads' feature lanes)
HIDDEN = 64
NUM_BLOCKS = 2
VOCAB = 50
MAX_SEQ = 16
ROWS = BATCH * SEQ                                 # 16  (batch folded into rows)

LN_EPS = 1e-5        # nn.LayerNorm default
KERNEL_EPS = 1e-4    # softmax_kernel eps

# Host-side constant folding (review item): these never appear as in-kernel multiplies.
NORM = DIM_HEAD ** -0.25                 # data_normalizer (per-head semantics)
HALF_NORM2 = 0.5 * NORM * NORM           # baked into the sum-of-squares weight
RATIO = NB_FEATURES ** -0.5              # projection_matrix.shape[0] ** -0.5
LOG_RATIO = math.log(RATIO)              # folded into the exponent
RATIO_EPS = RATIO * KERNEL_EPS           # folded eps term
INV_SQRT2 = 1.0 / math.sqrt(2.0)


# ------------------------- fused encoder kernel -------------------------
def encoder_kernel(x_ref, mavg_ref, mask64_ref, vbias_ref, wsq_ref,
                   wqk_ref, wvaug_ref, wpk_ref,
                   ln1g_ref, ln1b_ref, w1_ref, b1_ref, w2_ref, b2_ref,
                   ln2g_ref, ln2b_ref, o_ref):
    """Whole PerformerEncoder stack on one (ROWS, EMBED) activation slab.

    x_ref      : (ROWS, EMBED)            activations, batch folded into rows
    mavg_ref   : (EMBED, EMBED)           all-ones/EMBED -> LayerNorm stats on the MXU
    mask64_ref : (2*HM, 2*EMBED)          per-(batch,head) output/denominator block mask
    vbias_ref  : (1, 2*EMBED)             [0 | 1] bias appending the ones-column block to v
    wsq_ref    : (2*EMBED, 2*HM)          block-diag ones * 0.5*norm^2 (shared across blocks)
    w*_ref     : (NUM_BLOCKS, ...)        per-block weights, statically indexed
    """
    f32 = jnp.float32
    mavg = mavg_ref[...]
    mask64 = mask64_ref[...]
    vbias = vbias_ref[...]
    wsq = wsq_ref[...]

    # Constant masks, hoisted out of the block loop (iota compares, no integer div).
    lane = jax.lax.broadcasted_iota(jnp.int32, (1, 2 * HM), 1)      # (1,128)
    row = jax.lax.broadcasted_iota(jnp.int32, (ROWS, 1), 0)         # (16,1)
    group_masks = [(lane >= g * NB_FEATURES) & (lane < (g + 1) * NB_FEATURES)
                   for g in range(2 * NUM_HEADS)]                   # 8 x (1,128)
    b0_rows = row < SEQ                                             # (16,1)
    b1_rows = row >= SEQ
    lo_lanes = lane < HM                                            # (1,128)
    hi_lanes = lane >= HM
    m_lo = b0_rows & lo_lanes                                       # batch-0 rows, low half
    m_hi = b1_rows & hi_lanes                                       # batch-1 rows, high half

    def layer_norm(t, gamma, beta):
        # Mean / variance via tiny matmuls (MXU) instead of XLU reduce+broadcast roundtrips.
        mean = jnp.dot(t, mavg, preferred_element_type=f32)         # already broadcast (R,D)
        c = t - mean
        var = jnp.dot(c * c, mavg, preferred_element_type=f32)
        return c * jax.lax.rsqrt(var + LN_EPS) * gamma + beta

    x = x_ref[...].astype(f32)                                      # (R, D)

    for blk in range(NUM_BLOCKS):                 # statically unrolled (2 blocks)
        # ---------- PreLN(PerformerMultiHeadAttention): LN(attn(x)) + x ----------
        # Fused Q|K projection, and V with the ones-column block appended (no lane slicing).
        qk = jnp.dot(x, wqk_ref[blk], preferred_element_type=f32)             # (R, 64) [q|k]
        v_aug = jnp.dot(x, wvaug_ref[blk], preferred_element_type=f32) + vbias  # (R, 64) [v|1]

        # FAVOR+ softmax feature map for q AND k of all heads: two lane-dense 128-wide matmuls
        # (norm and 0.5*norm^2 are already folded into the weights).
        pd = jnp.dot(qk, wpk_ref[blk], preferred_element_type=f32)            # (R,128) [qd|kd]
        sq = jnp.dot(qk * qk, wsq, preferred_element_type=f32)                # (R,128) [qdiag|kdiag]

        # Exact stabilizer maxima of pd (= data_dash), matching the PyTorch softmax_kernel:
        #   q half : per (row, head) max;  k half : per (batch, head) max.
        gmax = None
        for g in range(2 * NUM_HEADS):            # 8 independent masked lane-reductions
            m_g = jnp.max(jnp.where(group_masks[g], pd, -jnp.inf),
                          axis=-1, keepdims=True)                              # (R,1)
            gmax = m_g if gmax is None else jnp.where(group_masks[g], m_g, gmax)
        kb0 = jnp.max(jnp.where(b0_rows, gmax, -jnp.inf), axis=0, keepdims=True)  # (1,128)
        kb1 = jnp.max(jnp.where(b1_rows, gmax, -jnp.inf), axis=0, keepdims=True)
        kmax = jnp.where(b0_rows, kb0, kb1)                                    # (R,128)
        stab = jnp.where(lo_lanes, gmax, kmax)                                 # (R,128)

        # ratio * (exp(z) + eps) == exp(z + log(ratio)) + ratio*eps  (constants folded).
        fe = jnp.exp(pd - sq - stab + LOG_RATIO) + RATIO_EPS                   # (R,128) [qp|kp]

        # Lane-stack batches: batch b occupies lanes [b*64, (b+1)*64).  One XLU roll swaps
        # the qp/kp halves; four selects place each batch's rows (exact segmentation kept).
        fr = pltpu.roll(fe, shift=HM, axis=1)                                  # (R,128) [kp|qp]
        qp_bd = jnp.where(m_lo, fe, jnp.where(m_hi, fr, 0.0))
        kp_bd = jnp.where(m_lo, fr, jnp.where(m_hi, fe, 0.0))

        # Linear attention: ONE transpose-contraction + ONE output matmul.
        #   ctx cols 0-31 : per-(batch,head,feature) context; cols 32-63 : ksum (ones trick).
        ctx = jax.lax.dot_general(kp_bd, v_aug, (((0,), (0,)), ((), ())),
                                  preferred_element_type=f32)                  # (128, 64)
        out2 = jnp.dot(qp_bd, ctx * mask64, preferred_element_type=f32)        # (R, 64) [num|den]
        attn = out2[:, :EMBED] / out2[:, EMBED:]                               # exact divide

        x = layer_norm(attn, ln1g_ref[blk], ln1b_ref[blk]) + x                 # LN(sub(x)) + x

        # ---------- PreLN(FeedForwardNetwork): LN(ffn(x)) + x ----------
        h1 = jnp.dot(x, w1_ref[blk], preferred_element_type=f32) + b1_ref[blk]  # (R, HIDDEN)
        h1 = 0.5 * h1 * (1.0 + jax.lax.erf(h1 * INV_SQRT2))                     # exact GELU
        y = jnp.dot(h1, w2_ref[blk], preferred_element_type=f32) + b2_ref[blk]  # (R, D)
        x = layer_norm(y, ln2g_ref[blk], ln2b_ref[blk]) + x

    o_ref[...] = x.astype(o_ref.dtype)


# ------------------------- pallas_call wrapper -------------------------
def _full_spec(shape):
    return pl.BlockSpec(shape, lambda i: (0,) * len(shape))


def performer_encoder_pallas(x2d, params):
    # Whole working set < 0.2 MiB -> everything resident in VMEM, one grid step.
    # (For large BATCH*SEQ, expose a row-tile grid axis marked "parallel" for v7x's 2nd core.)
    return pl.pallas_call(
        encoder_kernel,
        out_shape=jax.ShapeDtypeStruct((ROWS, EMBED), x2d.dtype),
        grid=(1,),
        in_specs=[
            _full_spec((ROWS, EMBED)),                   # x
            _full_spec((EMBED, EMBED)),                  # mavg
            _full_spec((2 * HM, 2 * EMBED)),             # mask64
            _full_spec((1, 2 * EMBED)),                  # vbias
            _full_spec((2 * EMBED, 2 * HM)),             # wsq (shared)
            _full_spec((NUM_BLOCKS, EMBED, 2 * EMBED)),  # wqk
            _full_spec((NUM_BLOCKS, EMBED, 2 * EMBED)),  # wvaug
            _full_spec((NUM_BLOCKS, 2 * EMBED, 2 * HM)), # wpk
            _full_spec((NUM_BLOCKS, 1, EMBED)),          # ln1_g
            _full_spec((NUM_BLOCKS, 1, EMBED)),          # ln1_b
            _full_spec((NUM_BLOCKS, EMBED, HIDDEN)),     # w1_t
            _full_spec((NUM_BLOCKS, 1, HIDDEN)),         # b1
            _full_spec((NUM_BLOCKS, HIDDEN, EMBED)),     # w2_t
            _full_spec((NUM_BLOCKS, 1, EMBED)),          # b2
            _full_spec((NUM_BLOCKS, 1, EMBED)),          # ln2_g
            _full_spec((NUM_BLOCKS, 1, EMBED)),          # ln2_b
        ],
        out_specs=_full_spec((ROWS, EMBED)),
        compiler_params=pltpu.CompilerParams(dimension_semantics=("arbitrary",)),
    )(x2d, params["mavg"], params["mask64"], params["vbias"], params["wsq"],
      params["wqk"], params["wvaug"], params["wpk"],
      params["ln1_g"], params["ln1_b"], params["w1_t"], params["b1"],
      params["w2_t"], params["b2"], params["ln2_g"], params["ln2_b"])


# ------------------------- parameter construction (glue) -------------------------
def gaussian_orthogonal_random_matrix(key, nb_rows, nb_cols):
    """JAX port of the PyTorch helper (scaling=0)."""
    n_full = nb_rows // nb_cols
    keys = jax.random.split(key, n_full + 2)
    blocks = []
    for i in range(n_full):
        blk = jax.random.normal(keys[i], (nb_cols, nb_cols), dtype=jnp.float32)
        q_mat, _ = jnp.linalg.qr(blk)
        blocks.append(q_mat.T)
    rem = nb_rows - n_full * nb_cols
    if rem > 0:
        blk = jax.random.normal(keys[n_full], (nb_cols, nb_cols), dtype=jnp.float32)
        q_mat, _ = jnp.linalg.qr(blk)
        blocks.append(q_mat.T[:rem])
    final = jnp.concatenate(blocks, axis=0)                              # (rows, cols)
    multiplier = jnp.linalg.norm(
        jax.random.normal(keys[-1], (nb_rows, nb_cols), dtype=jnp.float32), axis=1)
    return multiplier[:, None] * final


def xavier_uniform_t(key, fan_out, fan_in):
    limit = math.sqrt(6.0 / (fan_in + fan_out))
    # stored already transposed: (fan_in, fan_out) so the kernel computes x @ W
    return jax.random.uniform(key, (fan_in, fan_out), jnp.float32, -limit, limit)


def kaiming_normal_t(key, fan_out, fan_in):
    std = math.sqrt(2.0 / fan_in)
    return jax.random.normal(key, (fan_in, fan_out), jnp.float32) * std


def linear_bias(key, fan_out, fan_in):
    bound = 1.0 / math.sqrt(fan_in)
    return jax.random.uniform(key, (1, fan_out), jnp.float32, -bound, bound)


def make_block_params(key):
    ks = jax.random.split(key, 8)
    wq_t = xavier_uniform_t(ks[0], EMBED, EMBED)
    wk_t = xavier_uniform_t(ks[1], EMBED, EMBED)
    wv_t = xavier_uniform_t(ks[2], EMBED, EMBED)
    proj = gaussian_orthogonal_random_matrix(ks[3], NB_FEATURES, DIM_HEAD)      # (M, dh)
    eye_h = jnp.eye(NUM_HEADS, dtype=jnp.float32)
    eye_2 = jnp.eye(2, dtype=jnp.float32)
    proj_bd = jnp.kron(eye_h, proj.T)                                           # (D, HM)
    return dict(
        # fused [Wq | Wk] and [Wv | 0] (ones column added by a constant bias in-kernel)
        wqk=jnp.concatenate([wq_t, wk_t], axis=1),                              # (D, 2D)
        wvaug=jnp.concatenate([wv_t, jnp.zeros((EMBED, EMBED), jnp.float32)], axis=1),
        # data_normalizer folded into the block-diag FAVOR+ projection for q and k halves
        wpk=jnp.kron(eye_2, NORM * proj_bd),                                    # (2D, 2HM)
        ln1_g=jnp.ones((1, EMBED), jnp.float32),
        ln1_b=jnp.zeros((1, EMBED), jnp.float32),
        w1_t=kaiming_normal_t(ks[4], HIDDEN, EMBED),
        b1=linear_bias(ks[5], HIDDEN, EMBED),
        w2_t=kaiming_normal_t(ks[6], EMBED, HIDDEN),
        b2=linear_bias(ks[7], EMBED, HIDDEN),
        ln2_g=jnp.ones((1, EMBED), jnp.float32),
        ln2_b=jnp.zeros((1, EMBED), jnp.float32),
    )


def make_params(key):
    block_keys = jax.random.split(key, NUM_BLOCKS)
    per_block = [make_block_params(bk) for bk in block_keys]
    params = {name: jnp.stack([p[name] for p in per_block], axis=0)
              for name in per_block[0]}

    # Constant structural matrices shared by all blocks.
    eye_h = jnp.eye(NUM_HEADS, dtype=jnp.float32)
    eye_2 = jnp.eye(2, dtype=jnp.float32)
    ones_bd = jnp.kron(eye_h, jnp.ones((DIM_HEAD, NB_FEATURES), jnp.float32))   # (D, HM)
    params["wsq"] = jnp.kron(eye_2, HALF_NORM2 * ones_bd)                       # (2D, 2HM)
    hb = jnp.kron(eye_h, jnp.ones((NB_FEATURES, DIM_HEAD), jnp.float32))        # (HM, D)
    # [numerator head-block | denominator head-block], tiled over the 2 batch lane groups
    params["mask64"] = jnp.tile(jnp.concatenate([hb, hb], axis=1), (BATCH, 1))  # (2HM, 2D)
    params["mavg"] = jnp.full((EMBED, EMBED), 1.0 / EMBED, jnp.float32)
    params["vbias"] = jnp.concatenate(
        [jnp.zeros((1, EMBED), jnp.float32), jnp.ones((1, EMBED), jnp.float32)], axis=1)
    return params


# ------------------------- forward -------------------------
@jax.jit
def performer_encoder_forward(tokens, tok_emb, pos_emb, params):
    # Embedding glue (dropouts are identity in eval).
    # TODO(synk): exact Embedding class unknown; token + learned positional embedding used.
    b, n = tokens.shape
    x = tok_emb[tokens] + pos_emb[None, :n, :]
    x2d = x.reshape(b * n, EMBED).astype(jnp.float32)
    out2d = performer_encoder_pallas(x2d, params)
    return out2d.reshape(b, n, EMBED)


# ------------------------- main -------------------------
if __name__ == "__main__":
    root = jax.random.PRNGKey(0)
    k_tok, k_emb, k_pos, k_blocks = jax.random.split(root, 4)

    tokens = jax.random.randint(k_tok, (BATCH, SEQ), 0, VOCAB, dtype=jnp.int32)
    tok_emb = jax.random.normal(k_emb, (VOCAB, EMBED), jnp.float32) * 0.02
    pos_emb = jax.random.normal(k_pos, (MAX_SEQ, EMBED), jnp.float32) * 0.02

    params = make_params(k_blocks)

    out = performer_encoder_forward(tokens, tok_emb, pos_emb, params)
    out = jax.block_until_ready(out)

    assert out.shape == (BATCH, SEQ, EMBED)
    assert bool(jnp.all(jnp.isfinite(out)))
    print("KERNEL_OK")
</pallas_src>

<mosaic_0001>
module attributes {stable_mosaic.version = 11 : i64} {
  func.func @encoder_kernel(%arg0: i32, %arg1: memref<16x32xf32, #tpu.memory_space<vmem>>, %arg2: memref<32x32xf32, #tpu.memory_space<vmem>>, %arg3: memref<128x64xf32, #tpu.memory_space<vmem>>, %arg4: memref<1x64xf32, #tpu.memory_space<vmem>>, %arg5: memref<64x128xf32, #tpu.memory_space<vmem>>, %arg6: memref<2x32x64xf32, #tpu.memory_space<vmem>>, %arg7: memref<2x32x64xf32, #tpu.memory_space<vmem>>, %arg8: memref<2x64x128xf32, #tpu.memory_space<vmem>>, %arg9: memref<2x1x32xf32, #tpu.memory_space<vmem>>, %arg10: memref<2x1x32xf32, #tpu.memory_space<vmem>>, %arg11: memref<2x32x64xf32, #tpu.memory_space<vmem>>, %arg12: memref<2x1x64xf32, #tpu.memory_space<vmem>>, %arg13: memref<2x64x32xf32, #tpu.memory_space<vmem>>, %arg14: memref<2x1x32xf32, #tpu.memory_space<vmem>>, %arg15: memref<2x1x32xf32, #tpu.memory_space<vmem>>, %arg16: memref<2x1x32xf32, #tpu.memory_space<vmem>>, %arg17: memref<16x32xf32, #tpu.memory_space<vmem>>) attributes {dimension_semantics = [#tpu.dimension_semantics<arbitrary>], iteration_bounds = array<i64: 1>, scalar_prefetch = 0 : i64, scratch_operands = 0 : i64, tpu.core_type = #tpu.core_type<tc>, window_params = [{pipeline_mode = #tpu.pipeline_mode<synchronous>, transform_indices = @transform_0, window_bounds = array<i64: 16, 32>}, {pipeline_mode = #tpu.pipeline_mode<synchronous>, transform_indices = @transform_1, window_bounds = array<i64: 32, 32>}, {pipeline_mode = #tpu.pipeline_mode<synchronous>, transform_indices = @transform_2, window_bounds = array<i64: 128, 64>}, {pipeline_mode = #tpu.pipeline_mode<synchronous>, transform_indices = @transform_3, window_bounds = array<i64: 1, 64>}, {pipeline_mode = #tpu.pipeline_mode<synchronous>, transform_indices = @transform_4, window_bounds = array<i64: 64, 128>}, {pipeline_mode = #tpu.pipeline_mode<synchronous>, transform_indices = @transform_5, window_bounds = array<i64: 2, 32, 64>}, {pipeline_mode = #tpu.pipeline_mode<synchronous>, transform_indices = @transform_6, window_bounds = array<i64: 2, 32, 64>}, {pipeline_mode = #tpu.pipeline_mode<synchronous>, transform_indices = @transform_7, window_bounds = array<i64: 2, 64, 128>}, {pipeline_mode = #tpu.pipeline_mode<synchronous>, transform_indices = @transform_8, window_bounds = array<i64: 2, 1, 32>}, {pipeline_mode = #tpu.pipeline_mode<synchronous>, transform_indices = @transform_9, window_bounds = array<i64: 2, 1, 32>}, {pipeline_mode = #tpu.pipeline_mode<synchronous>, transform_indices = @transform_10, window_bounds = array<i64: 2, 32, 64>}, {pipeline_mode = #tpu.pipeline_mode<synchronous>, transform_indices = @transform_11, window_bounds = array<i64: 2, 1, 64>}, {pipeline_mode = #tpu.pipeline_mode<synchronous>, transform_indices = @transform_12, window_bounds = array<i64: 2, 64, 32>}, {pipeline_mode = #tpu.pipeline_mode<synchronous>, transform_indices = @transform_13, window_bounds = array<i64: 2, 1, 32>}, {pipeline_mode = #tpu.pipeline_mode<synchronous>, transform_indices = @transform_14, window_bounds = array<i64: 2, 1, 32>}, {pipeline_mode = #tpu.pipeline_mode<synchronous>, transform_indices = @transform_15, window_bounds = array<i64: 2, 1, 32>}, {pipeline_mode = #tpu.pipeline_mode<synchronous>, transform_indices = @transform_16, window_bounds = array<i64: 16, 32>}]} {
    %c0 = arith.constant 0 : index
    %c0_0 = arith.constant 0 : index
    %0 = vector.load %arg2[%c0, %c0_0] : memref<32x32xf32, #tpu.memory_space<vmem>>, vector<32x32xf32>
    %c0_1 = arith.constant 0 : index
    %c0_2 = arith.constant 0 : index
    %1 = vector.load %arg3[%c0_1, %c0_2] : memref<128x64xf32, #tpu.memory_space<vmem>>, vector<128x64xf32>
    %c0_3 = arith.constant 0 : index
    %c0_4 = arith.constant 0 : index
    %2 = vector.load %arg4[%c0_3, %c0_4] : memref<1x64xf32, #tpu.memory_space<vmem>>, vector<1x64xf32>
    %c0_5 = arith.constant 0 : index
    %c0_6 = arith.constant 0 : index
    %3 = vector.load %arg5[%c0_5, %c0_6] : memref<64x128xf32, #tpu.memory_space<vmem>>, vector<64x128xf32>
    %4 = tpu.iota {dimensions = array<i32: 1>} : vector<1x128xi32>
    %5 = tpu.iota {dimensions = array<i32: 0>} : vector<16x1xi32>
    %c0_i32 = arith.constant 0 : i32
    %6 = vector.broadcast %c0_i32 : i32 to vector<1x128xi32>
    %7 = arith.cmpi sge, %4, %6 : vector<1x128xi32>
    %c16_i32 = arith.constant 16 : i32
    %8 = vector.broadcast %c16_i32 : i32 to vector<1x128xi32>
    %9 = arith.cmpi slt, %4, %8 : vector<1x128xi32>
    %10 = arith.andi %7, %9 : vector<1x128xi1>
    %c16_i32_7 = arith.constant 16 : i32
    %11 = vector.broadcast %c16_i32_7 : i32 to vector<1x128xi32>
    %12 = arith.cmpi sge, %4, %11 : vector<1x128xi32>
    %c32_i32 = arith.constant 32 : i32
    %13 = vector.broadcast %c32_i32 : i32 to vector<1x128xi32>
    %14 = arith.cmpi slt, %4, %13 : vector<1x128xi32>
    %15 = arith.andi %12, %14 : vector<1x128xi1>
    %c32_i32_8 = arith.constant 32 : i32
    %16 = vector.broadcast %c32_i32_8 : i32 to vector<1x128xi32>
    %17 = arith.cmpi sge, %4, %16 : vector<1x128xi32>
    %c48_i32 = arith.constant 48 : i32
    %18 = vector.broadcast %c48_i32 : i32 to vector<1x128xi32>
    %19 = arith.cmpi slt, %4, %18 : vector<1x128xi32>
    %20 = arith.andi %17, %19 : vector<1x128xi1>
    %c48_i32_9 = arith.constant 48 : i32
    %21 = vector.broadcast %c48_i32_9 : i32 to vector<1x128xi32>
    %22 = arith.cmpi sge, %4, %21 : vector<1x128xi32>
    %c64_i32 = arith.constant 64 : i32
    %23 = vector.broadcast %c64_i32 : i32 to vector<1x128xi32>
    %24 = arith.cmpi slt, %4, %23 : vector<1x128xi32>
    %25 = arith.andi %22, %24 : vector<1x128xi1>
    %c64_i32_10 = arith.constant 64 : i32
    %26 = vector.broadcast %c64_i32_10 : i32 to vector<1x128xi32>
    %27 = arith.cmpi sge, %4, %26 : vector<1x128xi32>
    %c80_i32 = arith.constant 80 : i32
    %28 = vector.broadcast %c80_i32 : i32 to vector<1x128xi32>
    %29 = arith.cmpi slt, %4, %28 : vector<1x128xi32>
    %30 = arith.andi %27, %29 : vector<1x128xi1>
    %c80_i32_11 = arith.constant 80 : i32
    %31 = vector.broadcast %c80_i32_11 : i32 to vector<1x128xi32>
    %32 = arith.cmpi sge, %4, %31 : vector<1x128xi32>
    %c96_i32 = arith.constant 96 : i32
    %33 = vector.broadcast %c96_i32 : i32 to vector<1x128xi32>
    %34 = arith.cmpi slt, %4, %33 : vector<1x128xi32>
    %35 = arith.andi %32, %34 : vector<1x128xi1>
    %c96_i32_12 = arith.constant 96 : i32
    %36 = vector.broadcast %c96_i32_12 : i32 to vector<1x128xi32>
    %37 = arith.cmpi sge, %4, %36 : vector<1x128xi32>
    %c112_i32 = arith.constant 112 : i32
    %38 = vector.broadcast %c112_i32 : i32 to vector<1x128xi32>
    %39 = arith.cmpi slt, %4, %38 : vector<1x128xi32>
    %40 = arith.andi %37, %39 : vector<1x128xi1>
    %c112_i32_13 = arith.constant 112 : i32
    %41 = vector.broadcast %c112_i32_13 : i32 to vector<1x128xi32>
    %42 = arith.cmpi sge, %4, %41 : vector<1x128xi32>
    %c128_i32 = arith.constant 128 : i32
    %43 = vector.broadcast %c128_i32 : i32 to vector<1x128xi32>
    %44 = arith.cmpi slt, %4, %43 : vector<1x128xi32>
    %45 = arith.andi %42, %44 : vector<1x128xi1>
    %c8_i32 = arith.constant 8 : i32
    %46 = vector.broadcast %c8_i32 : i32 to vector<16x1xi32>
    %47 = arith.cmpi slt, %5, %46 : vector<16x1xi32>
    %c8_i32_14 = arith.constant 8 : i32
    %48 = vector.broadcast %c8_i32_14 : i32 to vector<16x1xi32>
    %49 = arith.cmpi sge, %5, %48 : vector<16x1xi32>
    %c64_i32_15 = arith.constant 64 : i32
    %50 = vector.broadcast %c64_i32_15 : i32 to vector<1x128xi32>
    %51 = arith.cmpi slt, %4, %50 : vector<1x128xi32>
    %c64_i32_16 = arith.constant 64 : i32
    %52 = vector.broadcast %c64_i32_16 : i32 to vector<1x128xi32>
    %53 = arith.cmpi sge, %4, %52 : vector<1x128xi32>
    %54 = vector.broadcast %47 : vector<16x1xi1> to vector<16x128xi1>
    %55 = vector.broadcast %51 : vector<1x128xi1> to vector<16x128xi1>
    %56 = arith.andi %54, %55 : vector<16x128xi1>
    %57 = vector.broadcast %49 : vector<16x1xi1> to vector<16x128xi1>
    %58 = vector.broadcast %53 : vector<1x128xi1> to vector<16x128xi1>
    %59 = arith.andi %57, %58 : vector<16x128xi1>
    %c0_17 = arith.constant 0 : index
    %c0_18 = arith.constant 0 : index
    %60 = vector.load %arg1[%c0_17, %c0_18] : memref<16x32xf32, #tpu.memory_space<vmem>>, vector<16x32xf32>
    %c0_19 = arith.constant 0 : index
    %c0_20 = arith.constant 0 : index
    %c0_21 = arith.constant 0 : index
    %61 = vector.load %arg6[%c0_19, %c0_20, %c0_21] : memref<2x32x64xf32, #tpu.memory_space<vmem>>, vector<1x32x64xf32>
    %62 = vector.shape_cast %61 : vector<1x32x64xf32> to vector<32x64xf32>
    %cst = arith.constant dense<0.000000e+00> : vector<16x64xf32>
    %63 = tpu.matmul %60, %62, %cst {dimension_numbers = #tpu.dot_dimension_numbers<[1], [0], [0], [1], [0, 0, 1, 1], [], []>} : vector<16x32xf32>, vector<32x64xf32>, vector<16x64xf32> -> vector<16x64xf32>
    %c0_22 = arith.constant 0 : index
    %c0_23 = arith.constant 0 : index
    %c0_24 = arith.constant 0 : index
    %64 = vector.load %arg7[%c0_22, %c0_23, %c0_24] : memref<2x32x64xf32, #tpu.memory_space<vmem>>, vector<1x32x64xf32>
    %65 = vector.shape_cast %64 : vector<1x32x64xf32> to vector<32x64xf32>
    %cst_25 = arith.constant dense<0.000000e+00> : vector<16x64xf32>
    %66 = tpu.matmul %60, %65, %cst_25 {dimension_numbers = #tpu.dot_dimension_numbers<[1], [0], [0], [1], [0, 0, 1, 1], [], []>} : vector<16x32xf32>, vector<32x64xf32>, vector<16x64xf32> -> vector<16x64xf32>
    %67 = vector.broadcast %2 : vector<1x64xf32> to vector<16x64xf32>
    %68 = arith.addf %66, %67 : vector<16x64xf32>
    %c0_26 = arith.constant 0 : index
    %c0_27 = arith.constant 0 : index
    %c0_28 = arith.constant 0 : index
    %69 = vector.load %arg8[%c0_26, %c0_27, %c0_28] : memref<2x64x128xf32, #tpu.memory_space<vmem>>, vector<1x64x128xf32>
    %70 = vector.shape_cast %69 : vector<1x64x128xf32> to vector<64x128xf32>
    %cst_29 = arith.constant dense<0.000000e+00> : vector<16x128xf32>
    %71 = tpu.matmul %63, %70, %cst_29 {dimension_numbers = #tpu.dot_dimension_numbers<[1], [0], [0], [1], [0, 0, 1, 1], [], []>} : vector<16x64xf32>, vector<64x128xf32>, vector<16x128xf32> -> vector<16x128xf32>
    %72 = arith.mulf %63, %63 : vector<16x64xf32>
    %cst_30 = arith.constant dense<0.000000e+00> : vector<16x128xf32>
    %73 = tpu.matmul %72, %3, %cst_30 {dimension_numbers = #tpu.dot_dimension_numbers<[1], [0], [0], [1], [0, 0, 1, 1], [], []>} : vector<16x64xf32>, vector<64x128xf32>, vector<16x128xf32> -> vector<16x128xf32>
    %cst_31 = arith.constant 0xFF800000 : f32
    %74 = vector.shape_cast %10 : vector<1x128xi1> to vector<1x128xi1>
    %75 = vector.broadcast %74 : vector<1x128xi1> to vector<16x128xi1>
    %76 = vector.broadcast %cst_31 : f32 to vector<16x128xf32>
    %77 = arith.select %75, %71, %76 : vector<16x128xi1>, vector<16x128xf32>
    %cst_32 = arith.constant dense<0xFF800000> : vector<16xf32>
    %78 = vector.multi_reduction <maximumf>, %77, %cst_32 [1] : vector<16x128xf32> to vector<16xf32>
    %79 = vector.shape_cast %78 : vector<16xf32> to vector<16x1xf32>
    %cst_33 = arith.constant 0xFF800000 : f32
    %80 = vector.shape_cast %15 : vector<1x128xi1> to vector<1x128xi1>
    %81 = vector.broadcast %80 : vector<1x128xi1> to vector<16x128xi1>
    %82 = vector.broadcast %cst_33 : f32 to vector<16x128xf32>
    %83 = arith.select %81, %71, %82 : vector<16x128xi1>, vector<16x128xf32>
    %cst_34 = arith.constant dense<0xFF800000> : vector<16xf32>
    %84 = vector.multi_reduction <maximumf>, %83, %cst_34 [1] : vector<16x128xf32> to vector<16xf32>
    %85 = vector.shape_cast %84 : vector<16xf32> to vector<16x1xf32>
    %86 = vector.shape_cast %15 : vector<1x128xi1> to vector<1x128xi1>
    %87 = vector.broadcast %86 : vector<1x128xi1> to vector<16x128xi1>
    %88 = vector.shape_cast %85 : vector<16x1xf32> to vector<16x1xf32>
    %89 = vector.broadcast %88 : vector<16x1xf32> to vector<16x128xf32>
    %90 = vector.shape_cast %79 : vector<16x1xf32> to vector<16x1xf32>
    %91 = vector.broadcast %90 : vector<16x1xf32> to vector<16x128xf32>
    %92 = arith.select %87, %89, %91 : vector<16x128xi1>, vector<16x128xf32>
    %cst_35 = arith.constant 0xFF800000 : f32
    %93 = vector.shape_cast %20 : vector<1x128xi1> to vector<1x128xi1>
    %94 = vector.broadcast %93 : vector<1x128xi1> to vector<16x128xi1>
    %95 = vector.broadcast %cst_35 : f32 to vector<16x128xf32>
    %96 = arith.select %94, %71, %95 : vector<16x128xi1>, vector<16x128xf32>
    %cst_36 = arith.constant dense<0xFF800000> : vector<16xf32>
    %97 = vector.multi_reduction <maximumf>, %96, %cst_36 [1] : vector<16x128xf32> to vector<16xf32>
    %98 = vector.shape_cast %97 : vector<16xf32> to vector<16x1xf32>
    %99 = vector.shape_cast %20 : vector<1x128xi1> to vector<1x128xi1>
    %100 = vector.broadcast %99 : vector<1x128xi1> to vector<16x128xi1>
    %101 = vector.shape_cast %98 : vector<16x1xf32> to vector<16x1xf32>
    %102 = vector.broadcast %101 : vector<16x1xf32> to vector<16x128xf32>
    %103 = arith.select %100, %102, %92 : vector<16x128xi1>, vector<16x128xf32>
    %cst_37 = arith.constant 0xFF800000 : f32
    %104 = vector.shape_cast %25 : vector<1x128xi1> to vector<1x128xi1>
    %105 = vector.broadcast %104 : vector<1x128xi1> to vector<16x128xi1>
    %106 = vector.broadcast %cst_37 : f32 to vector<16x128xf32>
    %107 = arith.select %105, %71, %106 : vector<16x128xi1>, vector<16x128xf32>
    %cst_38 = arith.constant dense<0xFF800000> : vector<16xf32>
    %108 = vector.multi_reduction <maximumf>, %107, %cst_38 [1] : vector<16x128xf32> to vector<16xf32>
    %109 = vector.shape_cast %108 : vector<16xf32> to vector<16x1xf32>
    %110 = vector.shape_cast %25 : vector<1x128xi1> to vector<1x128xi1>
    %111 = vector.broadcast %110 : vector<1x128xi1> to vector<16x128xi1>
    %112 = vector.shape_cast %109 : vector<16x1xf32> to vector<16x1xf32>
    %113 = vector.broadcast %112 : vector<16x1xf32> to vector<16x128xf32>
    %114 = arith.select %111, %113, %103 : vector<16x128xi1>, vector<16x128xf32>
    %cst_39 = arith.constant 0xFF800000 : f32
    %115 = vector.shape_cast %30 : vector<1x128xi1> to vector<1x128xi1>
    %116 = vector.broadcast %115 : vector<1x128xi1> to vector<16x128xi1>
    %117 = vector.broadcast %cst_39 : f32 to vector<16x128xf32>
    %118 = arith.select %116, %71, %117 : vector<16x128xi1>, vector<16x128xf32>
    %cst_40 = arith.constant dense<0xFF800000> : vector<16xf32>
    %119 = vector.multi_reduction <maximumf>, %118, %cst_40 [1] : vector<16x128xf32> to vector<16xf32>
    %120 = vector.shape_cast %119 : vector<16xf32> to vector<16x1xf32>
    %121 = vector.shape_cast %30 : vector<1x128xi1> to vector<1x128xi1>
    %122 = vector.broadcast %121 : vector<1x128xi1> to vector<16x128xi1>
    %123 = vector.shape_cast %120 : vector<16x1xf32> to vector<16x1xf32>
    %124 = vector.broadcast %123 : vector<16x1xf32> to vector<16x128xf32>
    %125 = arith.select %122, %124, %114 : vector<16x128xi1>, vector<16x128xf32>
    %cst_41 = arith.constant 0xFF800000 : f32
    %126 = vector.shape_cast %35 : vector<1x128xi1> to vector<1x128xi1>
    %127 = vector.broadcast %126 : vector<1x128xi1> to vector<16x128xi1>
    %128 = vector.broadcast %cst_41 : f32 to vector<16x128xf32>
    %129 = arith.select %127, %71, %128 : vector<16x128xi1>, vector<16x128xf32>
    %cst_42 = arith.constant dense<0xFF800000> : vector<16xf32>
    %130 = vector.multi_reduction <maximumf>, %129, %cst_42 [1] : vector<16x128xf32> to vector<16xf32>
    %131 = vector.shape_cast %130 : vector<16xf32> to vector<16x1xf32>
    %132 = vector.shape_cast %35 : vector<1x128xi1> to vector<1x128xi1>
    %133 = vector.broadcast %132 : vector<1x128xi1> to vector<16x128xi1>
    %134 = vector.shape_cast %131 : vector<16x1xf32> to vector<16x1xf32>
    %135 = vector.broadcast %134 : vector<16x1xf32> to vector<16x128xf32>
    %136 = arith.select %133, %135, %125 : vector<16x128xi1>, vector<16x128xf32>
    %cst_43 = arith.constant 0xFF800000 : f32
    %137 = vector.shape_cast %40 : vector<1x128xi1> to vector<1x128xi1>
    %138 = vector.broadcast %137 : vector<1x128xi1> to vector<16x128xi1>
    %139 = vector.broadcast %cst_43 : f32 to vector<16x128xf32>
    %140 = arith.select %138, %71, %139 : vector<16x128xi1>, vector<16x128xf32>
    %cst_44 = arith.constant dense<0xFF800000> : vector<16xf32>
    %141 = vector.multi_reduction <maximumf>, %140, %cst_44 [1] : vector<16x128xf32> to vector<16xf32>
    %142 = vector.shape_cast %141 : vector<16xf32> to vector<16x1xf32>
    %143 = vector.shape_cast %40 : vector<1x128xi1> to vector<1x128xi1>
    %144 = vector.broadcast %143 : vector<1x128xi1> to vector<16x128xi1>
    %145 = vector.shape_cast %142 : vector<16x1xf32> to vector<16x1xf32>
    %146 = vector.broadcast %145 : vector<16x1xf32> to vector<16x128xf32>
    %147 = arith.select %144, %146, %136 : vector<16x128xi1>, vector<16x128xf32>
    %cst_45 = arith.constant 0xFF800000 : f32
    %148 = vector.shape_cast %45 : vector<1x128xi1> to vector<1x128xi1>
    %149 = vector.broadcast %148 : vector<1x128xi1> to vector<16x128xi1>
    %150 = vector.broadcast %cst_45 : f32 to vector<16x128xf32>
    %151 = arith.select %149, %71, %150 : vector<16x128xi1>, vector<16x128xf32>
    %cst_46 = arith.constant dense<0xFF800000> : vector<16xf32>
    %152 = vector.multi_reduction <maximumf>, %151, %cst_46 [1] : vector<16x128xf32> to vector<16xf32>
    %153 = vector.shape_cast %152 : vector<16xf32> to vector<16x1xf32>
    %154 = vector.shape_cast %45 : vector<1x128xi1> to vector<1x128xi1>
    %155 = vector.broadcast %154 : vector<1x128xi1> to vector<16x128xi1>
    %156 = vector.shape_cast %153 : vector<16x1xf32> to vector<16x1xf32>
    %157 = vector.broadcast %156 : vector<16x1xf32> to vector<16x128xf32>
    %158 = arith.select %155, %157, %147 : vector<16x128xi1>, vector<16x128xf32>
    %cst_47 = arith.constant 0xFF800000 : f32
    %159 = vector.shape_cast %47 : vector<16x1xi1> to vector<16x1xi1>
    %160 = vector.broadcast %159 : vector<16x1xi1> to vector<16x128xi1>
    %161 = vector.broadcast %cst_47 : f32 to vector<16x128xf32>
    %162 = arith.select %160, %158, %161 : vector<16x128xi1>, vector<16x128xf32>
    %cst_48 = arith.constant dense<0xFF800000> : vector<128xf32>
    %163 = vector.multi_reduction <maximumf>, %162, %cst_48 [0] : vector<16x128xf32> to vector<128xf32>
    %164 = vector.shape_cast %163 : vector<128xf32> to vector<1x128xf32>
    %cst_49 = arith.constant 0xFF800000 : f32
    %165 = vector.shape_cast %49 : vector<16x1xi1> to vector<16x1xi1>
    %166 = vector.broadcast %165 : vector<16x1xi1> to vector<16x128xi1>
    %167 = vector.broadcast %cst_49 : f32 to vector<16x128xf32>
    %168 = arith.select %166, %158, %167 : vector<16x128xi1>, vector<16x128xf32>
    %cst_50 = arith.constant dense<0xFF800000> : vector<128xf32>
    %169 = vector.multi_reduction <maximumf>, %168, %cst_50 [0] : vector<16x128xf32> to vector<128xf32>
    %170 = vector.shape_cast %169 : vector<128xf32> to vector<1x128xf32>
    %171 = vector.shape_cast %47 : vector<16x1xi1> to vector<16x1xi1>
    %172 = vector.broadcast %171 : vector<16x1xi1> to vector<16x128xi1>
    %173 = vector.shape_cast %164 : vector<1x128xf32> to vector<1x128xf32>
    %174 = vector.broadcast %173 : vector<1x128xf32> to vector<16x128xf32>
    %175 = vector.shape_cast %170 : vector<1x128xf32> to vector<1x128xf32>
    %176 = vector.broadcast %175 : vector<1x128xf32> to vector<16x128xf32>
    %177 = arith.select %172, %174, %176 : vector<16x128xi1>, vector<16x128xf32>
    %178 = vector.shape_cast %51 : vector<1x128xi1> to vector<1x128xi1>
    %179 = vector.broadcast %178 : vector<1x128xi1> to vector<16x128xi1>
    %180 = arith.select %179, %158, %177 : vector<16x128xi1>, vector<16x128xf32>
    %181 = arith.subf %71, %73 : vector<16x128xf32>
    %182 = arith.subf %181, %180 : vector<16x128xf32>
    %cst_51 = arith.constant -1.38629436 : f32
    %183 = vector.broadcast %cst_51 : f32 to vector<16x128xf32>
    %184 = arith.addf %182, %183 : vector<16x128xf32>
    %185 = math.exp %184 : vector<16x128xf32>
    %cst_52 = arith.constant 2.500000e-05 : f32
    %186 = vector.broadcast %cst_52 : f32 to vector<16x128xf32>
    %187 = arith.addf %185, %186 : vector<16x128xf32>
    %c64_i32_53 = arith.constant 64 : i32
    %188 = tpu.dynamic_rotate %187 by %c64_i32_53 dim 1 : vector<16x128xf32>, i32 -> vector<16x128xf32>
    %cst_54 = arith.constant 0.000000e+00 : f32
    %189 = vector.broadcast %cst_54 : f32 to vector<16x128xf32>
    %190 = arith.select %59, %188, %189 : vector<16x128xi1>, vector<16x128xf32>
    %191 = arith.select %56, %187, %190 : vector<16x128xi1>, vector<16x128xf32>
    %cst_55 = arith.constant 0.000000e+00 : f32
    %192 = vector.broadcast %cst_55 : f32 to vector<16x128xf32>
    %193 = arith.select %59, %187, %192 : vector<16x128xi1>, vector<16x128xf32>
    %194 = arith.select %56, %188, %193 : vector<16x128xi1>, vector<16x128xf32>
    %cst_56 = arith.constant dense<0.000000e+00> : vector<128x64xf32>
    %195 = tpu.matmul %194, %68, %cst_56 {dimension_numbers = #tpu.dot_dimension_numbers<[0], [0], [1], [1], [0, 1, 1, 1], [], []>} : vector<16x128xf32>, vector<16x64xf32>, vector<128x64xf32> -> vector<128x64xf32>
    %196 = arith.mulf %195, %1 : vector<128x64xf32>
    %cst_57 = arith.constant dense<0.000000e+00> : vector<16x64xf32>
    %197 = tpu.matmul %191, %196, %cst_57 {dimension_numbers = #tpu.dot_dimension_numbers<[1], [0], [0], [1], [0, 0, 1, 1], [], []>} : vector<16x128xf32>, vector<128x64xf32>, vector<16x64xf32> -> vector<16x64xf32>
    %198 = vector.extract_strided_slice %197 {offsets = [0, 0], sizes = [16, 32], strides = [1, 1]} : vector<16x64xf32> to vector<16x32xf32>
    %199 = vector.extract_strided_slice %197 {offsets = [0, 32], sizes = [16, 32], strides = [1, 1]} : vector<16x64xf32> to vector<16x32xf32>
    %200 = arith.divf %198, %199 : vector<16x32xf32>
    %c0_58 = arith.constant 0 : index
    %c0_59 = arith.constant 0 : index
    %c0_60 = arith.constant 0 : index
    %201 = vector.load %arg9[%c0_58, %c0_59, %c0_60] : memref<2x1x32xf32, #tpu.memory_space<vmem>>, vector<1x1x32xf32>
    %202 = vector.shape_cast %201 : vector<1x1x32xf32> to vector<1x32xf32>
    %c0_61 = arith.constant 0 : index
    %c0_62 = arith.constant 0 : index
    %c0_63 = arith.constant 0 : index
    %203 = vector.load %arg10[%c0_61, %c0_62, %c0_63] : memref<2x1x32xf32, #tpu.memory_space<vmem>>, vector<1x1x32xf32>
    %204 = vector.shape_cast %203 : vector<1x1x32xf32> to vector<1x32xf32>
    %cst_64 = arith.constant dense<0.000000e+00> : vector<16x32xf32>
    %205 = tpu.matmul %200, %0, %cst_64 {dimension_numbers = #tpu.dot_dimension_numbers<[1], [0], [0], [1], [0, 0, 1, 1], [], []>} : vector<16x32xf32>, vector<32x32xf32>, vector<16x32xf32> -> vector<16x32xf32>
    %206 = arith.subf %200, %205 : vector<16x32xf32>
    %207 = arith.mulf %206, %206 : vector<16x32xf32>
    %cst_65 = arith.constant dense<0.000000e+00> : vector<16x32xf32>
    %208 = tpu.matmul %207, %0, %cst_65 {dimension_numbers = #tpu.dot_dimension_numbers<[1], [0], [0], [1], [0, 0, 1, 1], [], []>} : vector<16x32xf32>, vector<32x32xf32>, vector<16x32xf32> -> vector<16x32xf32>
    %cst_66 = arith.constant 9.99999974E-6 : f32
    %209 = vector.broadcast %cst_66 : f32 to vector<16x32xf32>
    %210 = arith.addf %208, %209 : vector<16x32xf32>
    %211 = math.rsqrt %210 : vector<16x32xf32>
    %212 = arith.mulf %206, %211 : vector<16x32xf32>
    %213 = vector.broadcast %202 : vector<1x32xf32> to vector<16x32xf32>
    %214 = arith.mulf %212, %213 : vector<16x32xf32>
    %215 = vector.broadcast %204 : vector<1x32xf32> to vector<16x32xf32>
    %216 = arith.addf %214, %215 : vector<16x32xf32>
    %217 = arith.addf %216, %60 : vector<16x32xf32>
    %c0_67 = arith.constant 0 : index
    %c0_68 = arith.constant 0 : index
    %c0_69 = arith.constant 0 : index
    %218 = vector.load %arg11[%c0_67, %c0_68, %c0_69] : memref<2x32x64xf32, #tpu.memory_space<vmem>>, vector<1x32x64xf32>
    %219 = vector.shape_cast %218 : vector<1x32x64xf32> to vector<32x64xf32>
    %cst_70 = arith.constant dense<0.000000e+00> : vector<16x64xf32>
    %220 = tpu.matmul %217, %219, %cst_70 {dimension_numbers = #tpu.dot_dimension_numbers<[1], [0], [0], [1], [0, 0, 1, 1], [], []>} : vector<16x32xf32>, vector<32x64xf32>, vector<16x64xf32> -> vector<16x64xf32>
    %c0_71 = arith.constant 0 : index
    %c0_72 = arith.constant 0 : index
    %c0_73 = arith.constant 0 : index
    %221 = vector.load %arg12[%c0_71, %c0_72, %c0_73] : memref<2x1x64xf32, #tpu.memory_space<vmem>>, vector<1x1x64xf32>
    %222 = vector.shape_cast %221 : vector<1x1x64xf32> to vector<1x64xf32>
    %223 = vector.broadcast %222 : vector<1x64xf32> to vector<16x64xf32>
    %224 = arith.addf %220, %223 : vector<16x64xf32>
    %cst_74 = arith.constant 5.000000e-01 : f32
    %225 = vector.broadcast %cst_74 : f32 to vector<16x64xf32>
    %226 = arith.mulf %225, %224 : vector<16x64xf32>
    %cst_75 = arith.constant 0.707106769 : f32
    %227 = vector.broadcast %cst_75 : f32 to vector<16x64xf32>
    %228 = arith.mulf %224, %227 : vector<16x64xf32>
    %229 = math.erf %228 : vector<16x64xf32>
    %cst_76 = arith.constant 1.000000e+00 : f32
    %230 = vector.broadcast %cst_76 : f32 to vector<16x64xf32>
    %231 = arith.addf %230, %229 : vector<16x64xf32>
    %232 = arith.mulf %226, %231 : vector<16x64xf32>
    %c0_77 = arith.constant 0 : index
    %c0_78 = arith.constant 0 : index
    %c0_79 = arith.constant 0 : index
    %233 = vector.load %arg13[%c0_77, %c0_78, %c0_79] : memref<2x64x32xf32, #tpu.memory_space<vmem>>, vector<1x64x32xf32>
    %234 = vector.shape_cast %233 : vector<1x64x32xf32> to vector<64x32xf32>
    %cst_80 = arith.constant dense<0.000000e+00> : vector<16x32xf32>
    %235 = tpu.matmul %232, %234, %cst_80 {dimension_numbers = #tpu.dot_dimension_numbers<[1], [0], [0], [1], [0, 0, 1, 1], [], []>} : vector<16x64xf32>, vector<64x32xf32>, vector<16x32xf32> -> vector<16x32xf32>
    %c0_81 = arith.constant 0 : index
    %c0_82 = arith.constant 0 : index
    %c0_83 = arith.constant 0 : index
    %236 = vector.load %arg14[%c0_81, %c0_82, %c0_83] : memref<2x1x32xf32, #tpu.memory_space<vmem>>, vector<1x1x32xf32>
    %237 = vector.shape_cast %236 : vector<1x1x32xf32> to vector<1x32xf32>
    %238 = vector.broadcast %237 : vector<1x32xf32> to vector<16x32xf32>
    %239 = arith.addf %235, %238 : vector<16x32xf32>
    %c0_84 = arith.constant 0 : index
    %c0_85 = arith.constant 0 : index
    %c0_86 = arith.constant 0 : index
    %240 = vector.load %arg15[%c0_84, %c0_85, %c0_86] : memref<2x1x32xf32, #tpu.memory_space<vmem>>, vector<1x1x32xf32>
    %241 = vector.shape_cast %240 : vector<1x1x32xf32> to vector<1x32xf32>
    %c0_87 = arith.constant 0 : index
    %c0_88 = arith.constant 0 : index
    %c0_89 = arith.constant 0 : index
    %242 = vector.load %arg16[%c0_87, %c0_88, %c0_89] : memref<2x1x32xf32, #tpu.memory_space<vmem>>, vector<1x1x32xf32>
    %243 = vector.shape_cast %242 : vector<1x1x32xf32> to vector<1x32xf32>
    %cst_90 = arith.constant dense<0.000000e+00> : vector<16x32xf32>
    %244 = tpu.matmul %239, %0, %cst_90 {dimension_numbers = #tpu.dot_dimension_numbers<[1], [0], [0], [1], [0, 0, 1, 1], [], []>} : vector<16x32xf32>, vector<32x32xf32>, vector<16x32xf32> -> vector<16x32xf32>
    %245 = arith.subf %239, %244 : vector<16x32xf32>
    %246 = arith.mulf %245, %245 : vector<16x32xf32>
    %cst_91 = arith.constant dense<0.000000e+00> : vector<16x32xf32>
    %247 = tpu.matmul %246, %0, %cst_91 {dimension_numbers = #tpu.dot_dimension_numbers<[1], [0], [0], [1], [0, 0, 1, 1], [], []>} : vector<16x32xf32>, vector<32x32xf32>, vector<16x32xf32> -> vector<16x32xf32>
    %cst_92 = arith.constant 9.99999974E-6 : f32
    %248 = vector.broadcast %cst_92 : f32 to vector<16x32xf32>
    %249 = arith.addf %247, %248 : vector<16x32xf32>
    %250 = math.rsqrt %249 : vector<16x32xf32>
    %251 = arith.mulf %245, %250 : vector<16x32xf32>
    %252 = vector.broadcast %241 : vector<1x32xf32> to vector<16x32xf32>
    %253 = arith.mulf %251, %252 : vector<16x32xf32>
    %254 = vector.broadcast %243 : vector<1x32xf32> to vector<16x32xf32>
    %255 = arith.addf %253, %254 : vector<16x32xf32>
    %256 = arith.addf %255, %217 : vector<16x32xf32>
    %c1 = arith.constant 1 : index
    %c0_93 = arith.constant 0 : index
    %c0_94 = arith.constant 0 : index
    %257 = vector.load %arg6[%c1, %c0_93, %c0_94] : memref<2x32x64xf32, #tpu.memory_space<vmem>>, vector<1x32x64xf32>
    %258 = vector.shape_cast %257 : vector<1x32x64xf32> to vector<32x64xf32>
    %cst_95 = arith.constant dense<0.000000e+00> : vector<16x64xf32>
    %259 = tpu.matmul %256, %258, %cst_95 {dimension_numbers = #tpu.dot_dimension_numbers<[1], [0], [0], [1], [0, 0, 1, 1], [], []>} : vector<16x32xf32>, vector<32x64xf32>, vector<16x64xf32> -> vector<16x64xf32>
    %c1_96 = arith.constant 1 : index
    %c0_97 = arith.constant 0 : index
    %c0_98 = arith.constant 0 : index
    %260 = vector.load %arg7[%c1_96, %c0_97, %c0_98] : memref<2x32x64xf32, #tpu.memory_space<vmem>>, vector<1x32x64xf32>
    %261 = vector.shape_cast %260 : vector<1x32x64xf32> to vector<32x64xf32>
    %cst_99 = arith.constant dense<0.000000e+00> : vector<16x64xf32>
    %262 = tpu.matmul %256, %261, %cst_99 {dimension_numbers = #tpu.dot_dimension_numbers<[1], [0], [0], [1], [0, 0, 1, 1], [], []>} : vector<16x32xf32>, vector<32x64xf32>, vector<16x64xf32> -> vector<16x64xf32>
    %263 = vector.broadcast %2 : vector<1x64xf32> to vector<16x64xf32>
    %264 = arith.addf %262, %263 : vector<16x64xf32>
    %c1_100 = arith.constant 1 : index
    %c0_101 = arith.constant 0 : index
    %c0_102 = arith.constant 0 : index
    %265 = vector.load %arg8[%c1_100, %c0_101, %c0_102] : memref<2x64x128xf32, #tpu.memory_space<vmem>>, vector<1x64x128xf32>
    %266 = vector.shape_cast %265 : vector<1x64x128xf32> to vector<64x128xf32>
    %cst_103 = arith.constant dense<0.000000e+00> : vector<16x128xf32>
    %267 = tpu.matmul %259, %266, %cst_103 {dimension_numbers = #tpu.dot_dimension_numbers<[1], [0], [0], [1], [0, 0, 1, 1], [], []>} : vector<16x64xf32>, vector<64x128xf32>, vector<16x128xf32> -> vector<16x128xf32>
    %268 = arith.mulf %259, %259 : vector<16x64xf32>
    %cst_104 = arith.constant dense<0.000000e+00> : vector<16x128xf32>
    %269 = tpu.matmul %268, %3, %cst_104 {dimension_numbers = #tpu.dot_dimension_numbers<[1], [0], [0], [1], [0, 0, 1, 1], [], []>} : vector<16x64xf32>, vector<64x128xf32>, vector<16x128xf32> -> vector<16x128xf32>
    %cst_105 = arith.constant 0xFF800000 : f32
    %270 = vector.shape_cast %10 : vector<1x128xi1> to vector<1x128xi1>
    %271 = vector.broadcast %270 : vector<1x128xi1> to vector<16x128xi1>
    %272 = vector.broadcast %cst_105 : f32 to vector<16x128xf32>
    %273 = arith.select %271, %267, %272 : vector<16x128xi1>, vector<16x128xf32>
    %cst_106 = arith.constant dense<0xFF800000> : vector<16xf32>
    %274 = vector.multi_reduction <maximumf>, %273, %cst_106 [1] : vector<16x128xf32> to vector<16xf32>
    %275 = vector.shape_cast %274 : vector<16xf32> to vector<16x1xf32>
    %cst_107 = arith.constant 0xFF800000 : f32
    %276 = vector.shape_cast %15 : vector<1x128xi1> to vector<1x128xi1>
    %277 = vector.broadcast %276 : vector<1x128xi1> to vector<16x128xi1>
    %278 = vector.broadcast %cst_107 : f32 to vector<16x128xf32>
    %279 = arith.select %277, %267, %278 : vector<16x128xi1>, vector<16x128xf32>
    %cst_108 = arith.constant dense<0xFF800000> : vector<16xf32>
    %280 = vector.multi_reduction <maximumf>, %279, %cst_108 [1] : vector<16x128xf32> to vector<16xf32>
    %281 = vector.shape_cast %280 : vector<16xf32> to vector<16x1xf32>
    %282 = vector.shape_cast %15 : vector<1x128xi1> to vector<1x128xi1>
    %283 = vector.broadcast %282 : vector<1x128xi1> to vector<16x128xi1>
    %284 = vector.shape_cast %281 : vector<16x1xf32> to vector<16x1xf32>
    %285 = vector.broadcast %284 : vector<16x1xf32> to vector<16x128xf32>
    %286 = vector.shape_cast %275 : vector<16x1xf32> to vector<16x1xf32>
    %287 = vector.broadcast %286 : vector<16x1xf32> to vector<16x128xf32>
    %288 = arith.select %283, %285, %287 : vector<16x128xi1>, vector<16x128xf32>
    %cst_109 = arith.constant 0xFF800000 : f32
    %289 = vector.shape_cast %20 : vector<1x128xi1> to vector<1x128xi1>
    %290 = vector.broadcast %289 : vector<1x128xi1> to vector<16x128xi1>
    %291 = vector.broadcast %cst_109 : f32 to vector<16x128xf32>
    %292 = arith.select %290, %267, %291 : vector<16x128xi1>, vector<16x128xf32>
    %cst_110 = arith.constant dense<0xFF800000> : vector<16xf32>
    %293 = vector.multi_reduction <maximumf>, %292, %cst_110 [1] : vector<16x128xf32> to vector<16xf32>
    %294 = vector.shape_cast %293 : vector<16xf32> to vector<16x1xf32>
    %295 = vector.shape_cast %20 : vector<1x128xi1> to vector<1x128xi1>
    %296 = vector.broadcast %295 : vector<1x128xi1> to vector<16x128xi1>
    %297 = vector.shape_cast %294 : vector<16x1xf32> to vector<16x1xf32>
    %298 = vector.broadcast %297 : vector<16x1xf32> to vector<16x128xf32>
    %299 = arith.select %296, %298, %288 : vector<16x128xi1>, vector<16x128xf32>
    %cst_111 = arith.constant 0xFF800000 : f32
    %300 = vector.shape_cast %25 : vector<1x128xi1> to vector<1x128xi1>
    %301 = vector.broadcast %300 : vector<1x128xi1> to vector<16x128xi1>
    %302 = vector.broadcast %cst_111 : f32 to vector<16x128xf32>
    %303 = arith.select %301, %267, %302 : vector<16x128xi1>, vector<16x128xf32>
    %cst_112 = arith.constant dense<0xFF800000> : vector<16xf32>
    %304 = vector.multi_reduction <maximumf>, %303, %cst_112 [1] : vector<16x128xf32> to vector<16xf32>
    %305 = vector.shape_cast %304 : vector<16xf32> to vector<16x1xf32>
    %306 = vector.shape_cast %25 : vector<1x128xi1> to vector<1x128xi1>
    %307 = vector.broadcast %306 : vector<1x128xi1> to vector<16x128xi1>
    %308 = vector.shape_cast %305 : vector<16x1xf32> to vector<16x1xf32>
    %309 = vector.broadcast %308 : vector<16x1xf32> to vector<16x128xf32>
    %310 = arith.select %307, %309, %299 : vector<16x128xi1>, vector<16x128xf32>
    %cst_113 = arith.constant 0xFF800000 : f32
    %311 = vector.shape_cast %30 : vector<1x128xi1> to vector<1x128xi1>
    %312 = vector.broadcast %311 : vector<1x128xi1> to vector<16x128xi1>
    %313 = vector.broadcast %cst_113 : f32 to vector<16x128xf32>
    %314 = arith.select %312, %267, %313 : vector<16x128xi1>, vector<16x128xf32>
    %cst_114 = arith.constant dense<0xFF800000> : vector<16xf32>
    %315 = vector.multi_reduction <maximumf>, %314, %cst_114 [1] : vector<16x128xf32> to vector<16xf32>
    %316 = vector.shape_cast %315 : vector<16xf32> to vector<16x1xf32>
    %317 = vector.shape_cast %30 : vector<1x128xi1> to vector<1x128xi1>
    %318 = vector.broadcast %317 : vector<1x128xi1> to vector<16x128xi1>
    %319 = vector.shape_cast %316 : vector<16x1xf32> to vector<16x1xf32>
    %320 = vector.broadcast %319 : vector<16x1xf32> to vector<16x128xf32>
    %321 = arith.select %318, %320, %310 : vector<16x128xi1>, vector<16x128xf32>
    %cst_115 = arith.constant 0xFF800000 : f32
    %322 = vector.shape_cast %35 : vector<1x128xi1> to vector<1x128xi1>
    %323 = vector.broadcast %322 : vector<1x128xi1> to vector<16x128xi1>
    %324 = vector.broadcast %cst_115 : f32 to vector<16x128xf32>
    %325 = arith.select %323, %267, %324 : vector<16x128xi1>, vector<16x128xf32>
    %cst_116 = arith.constant dense<0xFF800000> : vector<16xf32>
    %326 = vector.multi_reduction <maximumf>, %325, %cst_116 [1] : vector<16x128xf32> to vector<16xf32>
    %327 = vector.shape_cast %326 : vector<16xf32> to vector<16x1xf32>
    %328 = vector.shape_cast %35 : vector<1x128xi1> to vector<1x128xi1>
    %329 = vector.broadcast %328 : vector<1x128xi1> to vector<16x128xi1>
    %330 = vector.shape_cast %327 : vector<16x1xf32> to vector<16x1xf32>
    %331 = vector.broadcast %330 : vector<16x1xf32> to vector<16x128xf32>
    %332 = arith.select %329, %331, %321 : vector<16x128xi1>, vector<16x128xf32>
    %cst_117 = arith.constant 0xFF800000 : f32
    %333 = vector.shape_cast %40 : vector<1x128xi1> to vector<1x128xi1>
    %334 = vector.broadcast %333 : vector<1x128xi1> to vector<16x128xi1>
    %335 = vector.broadcast %cst_117 : f32 to vector<16x128xf32>
    %336 = arith.select %334, %267, %335 : vector<16x128xi1>, vector<16x128xf32>
    %cst_118 = arith.constant dense<0xFF800000> : vector<16xf32>
    %337 = vector.multi_reduction <maximumf>, %336, %cst_118 [1] : vector<16x128xf32> to vector<16xf32>
    %338 = vector.shape_cast %337 : vector<16xf32> to vector<16x1xf32>
    %339 = vector.shape_cast %40 : vector<1x128xi1> to vector<1x128xi1>
    %340 = vector.broadcast %339 : vector<1x128xi1> to vector<16x128xi1>
    %341 = vector.shape_cast %338 : vector<16x1xf32> to vector<16x1xf32>
    %342 = vector.broadcast %341 : vector<16x1xf32> to vector<16x128xf32>
    %343 = arith.select %340, %342, %332 : vector<16x128xi1>, vector<16x128xf32>
    %cst_119 = arith.constant 0xFF800000 : f32
    %344 = vector.shape_cast %45 : vector<1x128xi1> to vector<1x128xi1>
    %345 = vector.broadcast %344 : vector<1x128xi1> to vector<16x128xi1>
    %346 = vector.broadcast %cst_119 : f32 to vector<16x128xf32>
    %347 = arith.select %345, %267, %346 : vector<16x128xi1>, vector<16x128xf32>
    %cst_120 = arith.constant dense<0xFF800000> : vector<16xf32>
    %348 = vector.multi_reduction <maximumf>, %347, %cst_120 [1] : vector<16x128xf32> to vector<16xf32>
    %349 = vector.shape_cast %348 : vector<16xf32> to vector<16x1xf32>
    %350 = vector.shape_cast %45 : vector<1x128xi1> to vector<1x128xi1>
    %351 = vector.broadcast %350 : vector<1x128xi1> to vector<16x128xi1>
    %352 = vector.shape_cast %349 : vector<16x1xf32> to vector<16x1xf32>
    %353 = vector.broadcast %352 : vector<16x1xf32> to vector<16x128xf32>
    %354 = arith.select %351, %353, %343 : vector<16x128xi1>, vector<16x128xf32>
    %cst_121 = arith.constant 0xFF800000 : f32
    %355 = vector.shape_cast %47 : vector<16x1xi1> to vector<16x1xi1>
    %356 = vector.broadcast %355 : vector<16x1xi1> to vector<16x128xi1>
    %357 = vector.broadcast %cst_121 : f32 to vector<16x128xf32>
    %358 = arith.select %356, %354, %357 : vector<16x128xi1>, vector<16x128xf32>
    %cst_122 = arith.constant dense<0xFF800000> : vector<128xf32>
    %359 = vector.multi_reduction <maximumf>, %358, %cst_122 [0] : vector<16x128xf32> to vector<128xf32>
    %360 = vector.shape_cast %359 : vector<128xf32> to vector<1x128xf32>
    %cst_123 = arith.constant 0xFF800000 : f32
    %361 = vector.shape_cast %49 : vector<16x1xi1> to vector<16x1xi1>
    %362 = vector.broadcast %361 : vector<16x1xi1> to vector<16x128xi1>
    %363 = vector.broadcast %cst_123 : f32 to vector<16x128xf32>
    %364 = arith.select %362, %354, %363 : vector<16x128xi1>, vector<16x128xf32>
    %cst_124 = arith.constant dense<0xFF800000> : vector<128xf32>
    %365 = vector.multi_reduction <maximumf>, %364, %cst_124 [0] : vector<16x128xf32> to vector<128xf32>
    %366 = vector.shape_cast %365 : vector<128xf32> to vector<1x128xf32>
    %367 = vector.shape_cast %47 : vector<16x1xi1> to vector<16x1xi1>
    %368 = vector.broadcast %367 : vector<16x1xi1> to vector<16x128xi1>
    %369 = vector.shape_cast %360 : vector<1x128xf32> to vector<1x128xf32>
    %370 = vector.broadcast %369 : vector<1x128xf32> to vector<16x128xf32>
    %371 = vector.shape_cast %366 : vector<1x128xf32> to vector<1x128xf32>
    %372 = vector.broadcast %371 : vector<1x128xf32> to vector<16x128xf32>
    %373 = arith.select %368, %370, %372 : vector<16x128xi1>, vector<16x128xf32>
    %374 = vector.shape_cast %51 : vector<1x128xi1> to vector<1x128xi1>
    %375 = vector.broadcast %374 : vector<1x128xi1> to vector<16x128xi1>
    %376 = arith.select %375, %354, %373 : vector<16x128xi1>, vector<16x128xf32>
    %377 = arith.subf %267, %269 : vector<16x128xf32>
    %378 = arith.subf %377, %376 : vector<16x128xf32>
    %cst_125 = arith.constant -1.38629436 : f32
    %379 = vector.broadcast %cst_125 : f32 to vector<16x128xf32>
    %380 = arith.addf %378, %379 : vector<16x128xf32>
    %381 = math.exp %380 : vector<16x128xf32>
    %cst_126 = arith.constant 2.500000e-05 : f32
    %382 = vector.broadcast %cst_126 : f32 to vector<16x128xf32>
    %383 = arith.addf %381, %382 : vector<16x128xf32>
    %c64_i32_127 = arith.constant 64 : i32
    %384 = tpu.dynamic_rotate %383 by %c64_i32_127 dim 1 : vector<16x128xf32>, i32 -> vector<16x128xf32>
    %cst_128 = arith.constant 0.000000e+00 : f32
    %385 = vector.broadcast %cst_128 : f32 to vector<16x128xf32>
    %386 = arith.select %59, %384, %385 : vector<16x128xi1>, vector<16x128xf32>
    %387 = arith.select %56, %383, %386 : vector<16x128xi1>, vector<16x128xf32>
    %cst_129 = arith.constant 0.000000e+00 : f32
    %388 = vector.broadcast %cst_129 : f32 to vector<16x128xf32>
    %389 = arith.select %59, %383, %388 : vector<16x128xi1>, vector<16x128xf32>
    %390 = arith.select %56, %384, %389 : vector<16x128xi1>, vector<16x128xf32>
    %cst_130 = arith.constant dense<0.000000e+00> : vector<128x64xf32>
    %391 = tpu.matmul %390, %264, %cst_130 {dimension_numbers = #tpu.dot_dimension_numbers<[0], [0], [1], [1], [0, 1, 1, 1], [], []>} : vector<16x128xf32>, vector<16x64xf32>, vector<128x64xf32> -> vector<128x64xf32>
    %392 = arith.mulf %391, %1 : vector<128x64xf32>
    %cst_131 = arith.constant dense<0.000000e+00> : vector<16x64xf32>
    %393 = tpu.matmul %387, %392, %cst_131 {dimension_numbers = #tpu.dot_dimension_numbers<[1], [0], [0], [1], [0, 0, 1, 1], [], []>} : vector<16x128xf32>, vector<128x64xf32>, vector<16x64xf32> -> vector<16x64xf32>
    %394 = vector.extract_strided_slice %393 {offsets = [0, 0], sizes = [16, 32], strides = [1, 1]} : vector<16x64xf32> to vector<16x32xf32>
    %395 = vector.extract_strided_slice %393 {offsets = [0, 32], sizes = [16, 32], strides = [1, 1]} : vector<16x64xf32> to vector<16x32xf32>
    %396 = arith.divf %394, %395 : vector<16x32xf32>
    %c1_132 = arith.constant 1 : index
    %c0_133 = arith.constant 0 : index
    %c0_134 = arith.constant 0 : index
    %397 = vector.load %arg9[%c1_132, %c0_133, %c0_134] : memref<2x1x32xf32, #tpu.memory_space<vmem>>, vector<1x1x32xf32>
    %398 = vector.shape_cast %397 : vector<1x1x32xf32> to vector<1x32xf32>
    %c1_135 = arith.constant 1 : index
    %c0_136 = arith.constant 0 : index
    %c0_137 = arith.constant 0 : index
    %399 = vector.load %arg10[%c1_135, %c0_136, %c0_137] : memref<2x1x32xf32, #tpu.memory_space<vmem>>, vector<1x1x32xf32>
    %400 = vector.shape_cast %399 : vector<1x1x32xf32> to vector<1x32xf32>
    %cst_138 = arith.constant dense<0.000000e+00> : vector<16x32xf32>
    %401 = tpu.matmul %396, %0, %cst_138 {dimension_numbers = #tpu.dot_dimension_numbers<[1], [0], [0], [1], [0, 0, 1, 1], [], []>} : vector<16x32xf32>, vector<32x32xf32>, vector<16x32xf32> -> vector<16x32xf32>
    %402 = arith.subf %396, %401 : vector<16x32xf32>
    %403 = arith.mulf %402, %402 : vector<16x32xf32>
    %cst_139 = arith.constant dense<0.000000e+00> : vector<16x32xf32>
    %404 = tpu.matmul %403, %0, %cst_139 {dimension_numbers = #tpu.dot_dimension_numbers<[1], [0], [0], [1], [0, 0, 1, 1], [], []>} : vector<16x32xf32>, vector<32x32xf32>, vector<16x32xf32> -> vector<16x32xf32>
    %cst_140 = arith.constant 9.99999974E-6 : f32
    %405 = vector.broadcast %cst_140 : f32 to vector<16x32xf32>
    %406 = arith.addf %404, %405 : vector<16x32xf32>
    %407 = math.rsqrt %406 : vector<16x32xf32>
    %408 = arith.mulf %402, %407 : vector<16x32xf32>
    %409 = vector.broadcast %398 : vector<1x32xf32> to vector<16x32xf32>
    %410 = arith.mulf %408, %409 : vector<16x32xf32>
    %411 = vector.broadcast %400 : vector<1x32xf32> to vector<16x32xf32>
    %412 = arith.addf %410, %411 : vector<16x32xf32>
    %413 = arith.addf %412, %256 : vector<16x32xf32>
    %c1_141 = arith.constant 1 : index
    %c0_142 = arith.constant 0 : index
    %c0_143 = arith.constant 0 : index
    %414 = vector.load %arg11[%c1_141, %c0_142, %c0_143] : memref<2x32x64xf32, #tpu.memory_space<vmem>>, vector<1x32x64xf32>
    %415 = vector.shape_cast %414 : vector<1x32x64xf32> to vector<32x64xf32>
    %cst_144 = arith.constant dense<0.000000e+00> : vector<16x64xf32>
    %416 = tpu.matmul %413, %415, %cst_144 {dimension_numbers = #tpu.dot_dimension_numbers<[1], [0], [0], [1], [0, 0, 1, 1], [], []>} : vector<16x32xf32>, vector<32x64xf32>, vector<16x64xf32> -> vector<16x64xf32>
    %c1_145 = arith.constant 1 : index
    %c0_146 = arith.constant 0 : index
    %c0_147 = arith.constant 0 : index
    %417 = vector.load %arg12[%c1_145, %c0_146, %c0_147] : memref<2x1x64xf32, #tpu.memory_space<vmem>>, vector<1x1x64xf32>
    %418 = vector.shape_cast %417 : vector<1x1x64xf32> to vector<1x64xf32>
    %419 = vector.broadcast %418 : vector<1x64xf32> to vector<16x64xf32>
    %420 = arith.addf %416, %419 : vector<16x64xf32>
    %cst_148 = arith.constant 5.000000e-01 : f32
    %421 = vector.broadcast %cst_148 : f32 to vector<16x64xf32>
    %422 = arith.mulf %421, %420 : vector<16x64xf32>
    %cst_149 = arith.constant 0.707106769 : f32
    %423 = vector.broadcast %cst_149 : f32 to vector<16x64xf32>
    %424 = arith.mulf %420, %423 : vector<16x64xf32>
    %425 = math.erf %424 : vector<16x64xf32>
    %cst_150 = arith.constant 1.000000e+00 : f32
    %426 = vector.broadcast %cst_150 : f32 to vector<16x64xf32>
    %427 = arith.addf %426, %425 : vector<16x64xf32>
    %428 = arith.mulf %422, %427 : vector<16x64xf32>
    %c1_151 = arith.constant 1 : index
    %c0_152 = arith.constant 0 : index
    %c0_153 = arith.constant 0 : index
    %429 = vector.load %arg13[%c1_151, %c0_152, %c0_153] : memref<2x64x32xf32, #tpu.memory_space<vmem>>, vector<1x64x32xf32>
    %430 = vector.shape_cast %429 : vector<1x64x32xf32> to vector<64x32xf32>
    %cst_154 = arith.constant dense<0.000000e+00> : vector<16x32xf32>
    %431 = tpu.matmul %428, %430, %cst_154 {dimension_numbers = #tpu.dot_dimension_numbers<[1], [0], [0], [1], [0, 0, 1, 1], [], []>} : vector<16x64xf32>, vector<64x32xf32>, vector<16x32xf32> -> vector<16x32xf32>
    %c1_155 = arith.constant 1 : index
    %c0_156 = arith.constant 0 : index
    %c0_157 = arith.constant 0 : index
    %432 = vector.load %arg14[%c1_155, %c0_156, %c0_157] : memref<2x1x32xf32, #tpu.memory_space<vmem>>, vector<1x1x32xf32>
    %433 = vector.shape_cast %432 : vector<1x1x32xf32> to vector<1x32xf32>
    %434 = vector.broadcast %433 : vector<1x32xf32> to vector<16x32xf32>
    %435 = arith.addf %431, %434 : vector<16x32xf32>
    %c1_158 = arith.constant 1 : index
    %c0_159 = arith.constant 0 : index
    %c0_160 = arith.constant 0 : index
    %436 = vector.load %arg15[%c1_158, %c0_159, %c0_160] : memref<2x1x32xf32, #tpu.memory_space<vmem>>, vector<1x1x32xf32>
    %437 = vector.shape_cast %436 : vector<1x1x32xf32> to vector<1x32xf32>
    %c1_161 = arith.constant 1 : index
    %c0_162 = arith.constant 0 : index
    %c0_163 = arith.constant 0 : index
    %438 = vector.load %arg16[%c1_161, %c0_162, %c0_163] : memref<2x1x32xf32, #tpu.memory_space<vmem>>, vector<1x1x32xf32>
    %439 = vector.shape_cast %438 : vector<1x1x32xf32> to vector<1x32xf32>
    %cst_164 = arith.constant dense<0.000000e+00> : vector<16x32xf32>
    %440 = tpu.matmul %435, %0, %cst_164 {dimension_numbers = #tpu.dot_dimension_numbers<[1], [0], [0], [1], [0, 0, 1, 1], [], []>} : vector<16x32xf32>, vector<32x32xf32>, vector<16x32xf32> -> vector<16x32xf32>
    %441 = arith.subf %435, %440 : vector<16x32xf32>
    %442 = arith.mulf %441, %441 : vector<16x32xf32>
    %cst_165 = arith.constant dense<0.000000e+00> : vector<16x32xf32>
    %443 = tpu.matmul %442, %0, %cst_165 {dimension_numbers = #tpu.dot_dimension_numbers<[1], [0], [0], [1], [0, 0, 1, 1], [], []>} : vector<16x32xf32>, vector<32x32xf32>, vector<16x32xf32> -> vector<16x32xf32>
    %cst_166 = arith.constant 9.99999974E-6 : f32
    %444 = vector.broadcast %cst_166 : f32 to vector<16x32xf32>
    %445 = arith.addf %443, %444 : vector<16x32xf32>
    %446 = math.rsqrt %445 : vector<16x32xf32>
    %447 = arith.mulf %441, %446 : vector<16x32xf32>
    %448 = vector.broadcast %437 : vector<1x32xf32> to vector<16x32xf32>
    %449 = arith.mulf %447, %448 : vector<16x32xf32>
    %450 = vector.broadcast %439 : vector<1x32xf32> to vector<16x32xf32>
    %451 = arith.addf %449, %450 : vector<16x32xf32>
    %452 = arith.addf %451, %413 : vector<16x32xf32>
    %c0_167 = arith.constant 0 : index
    %c0_168 = arith.constant 0 : index
    %453 = vector.load %arg17[%c0_167, %c0_168] : memref<16x32xf32, #tpu.memory_space<vmem>>, vector<16x32xf32>
    tpu.vector_store %arg17[%c0_167, %c0_168], %452 {strides = array<i32>} : memref<16x32xf32, #tpu.memory_space<vmem>>, vector<16x32xf32>,
    return
  }
  func.func @transform_0(%arg0: i32) -> (i32, i32) {
    %c0_i32 = arith.constant 0 : i32
    %c0_i32_0 = arith.constant 0 : i32
    %c0_i32_1 = arith.constant 0 : i32
    return %c0_i32, %c0_i32_0 : i32, i32
  }
  func.func @transform_1(%arg0: i32) -> (i32, i32) {
    %c0_i32 = arith.constant 0 : i32
    %c0_i32_0 = arith.constant 0 : i32
    %c0_i32_1 = arith.constant 0 : i32
    return %c0_i32, %c0_i32_0 : i32, i32
  }
  func.func @transform_2(%arg0: i32) -> (i32, i32) {
    %c0_i32 = arith.constant 0 : i32
    %c0_i32_0 = arith.constant 0 : i32
    %c0_i32_1 = arith.constant 0 : i32
    return %c0_i32, %c0_i32_0 : i32, i32
  }
  func.func @transform_3(%arg0: i32) -> (i32, i32) {
    %c0_i32 = arith.constant 0 : i32
    %c0_i32_0 = arith.constant 0 : i32
    %c0_i32_1 = arith.constant 0 : i32
    return %c0_i32, %c0_i32_0 : i32, i32
  }
  func.func @transform_4(%arg0: i32) -> (i32, i32) {
    %c0_i32 = arith.constant 0 : i32
    %c0_i32_0 = arith.constant 0 : i32
    %c0_i32_1 = arith.constant 0 : i32
    return %c0_i32, %c0_i32_0 : i32, i32
  }
  func.func @transform_5(%arg0: i32) -> (i32, i32, i32) {
    %c0_i32 = arith.constant 0 : i32
    %c0_i32_0 = arith.constant 0 : i32
    %c0_i32_1 = arith.constant 0 : i32
    %c0_i32_2 = arith.constant 0 : i32
    return %c0_i32, %c0_i32_0, %c0_i32_1 : i32, i32, i32
  }
  func.func @transform_6(%arg0: i32) -> (i32, i32, i32) {
    %c0_i32 = arith.constant 0 : i32
    %c0_i32_0 = arith.constant 0 : i32
    %c0_i32_1 = arith.constant 0 : i32
    %c0_i32_2 = arith.constant 0 : i32
    return %c0_i32, %c0_i32_0, %c0_i32_1 : i32, i32, i32
  }
  func.func @transform_7(%arg0: i32) -> (i32, i32, i32) {
    %c0_i32 = arith.constant 0 : i32
    %c0_i32_0 = arith.constant 0 : i32
    %c0_i32_1 = arith.constant 0 : i32
    %c0_i32_2 = arith.constant 0 : i32
    return %c0_i32, %c0_i32_0, %c0_i32_1 : i32, i32, i32
  }
  func.func @transform_8(%arg0: i32) -> (i32, i32, i32) {
    %c0_i32 = arith.constant 0 : i32
    %c0_i32_0 = arith.constant 0 : i32
    %c0_i32_1 = arith.constant 0 : i32
    %c0_i32_2 = arith.constant 0 : i32
    return %c0_i32, %c0_i32_0, %c0_i32_1 : i32, i32, i32
  }
  func.func @transform_9(%arg0: i32) -> (i32, i32, i32) {
    %c0_i32 = arith.constant 0 : i32
    %c0_i32_0 = arith.constant 0 : i32
    %c0_i32_1 = arith.constant 0 : i32
    %c0_i32_2 = arith.constant 0 : i32
    return %c0_i32, %c0_i32_0, %c0_i32_1 : i32, i32, i32
  }
  func.func @transform_10(%arg0: i32) -> (i32, i32, i32) {
    %c0_i32 = arith.constant 0 : i32
    %c0_i32_0 = arith.constant 0 : i32
    %c0_i32_1 = arith.constant 0 : i32
    %c0_i32_2 = arith.constant 0 : i32
    return %c0_i32, %c0_i32_0, %c0_i32_1 : i32, i32, i32
  }
  func.func @transform_11(%arg0: i32) -> (i32, i32, i32) {
    %c0_i32 = arith.constant 0 : i32
    %c0_i32_0 = arith.constant 0 : i32
    %c0_i32_1 = arith.constant 0 : i32
    %c0_i32_2 = arith.constant 0 : i32
    return %c0_i32, %c0_i32_0, %c0_i32_1 : i32, i32, i32
  }
  func.func @transform_12(%arg0: i32) -> (i32, i32, i32) {
    %c0_i32 = arith.constant 0 : i32
    %c0_i32_0 = arith.constant 0 : i32
    %c0_i32_1 = arith.constant 0 : i32
    %c0_i32_2 = arith.constant 0 : i32
    return %c0_i32, %c0_i32_0, %c0_i32_1 : i32, i32, i32
  }
  func.func @transform_13(%arg0: i32) -> (i32, i32, i32) {
    %c0_i32 = arith.constant 0 : i32
    %c0_i32_0 = arith.constant 0 : i32
    %c0_i32_1 = arith.constant 0 : i32
    %c0_i32_2 = arith.constant 0 : i32
    return %c0_i32, %c0_i32_0, %c0_i32_1 : i32, i32, i32
  }
  func.func @transform_14(%arg0: i32) -> (i32, i32, i32) {
    %c0_i32 = arith.constant 0 : i32
    %c0_i32_0 = arith.constant 0 : i32
    %c0_i32_1 = arith.constant 0 : i32
    %c0_i32_2 = arith.constant 0 : i32
    return %c0_i32, %c0_i32_0, %c0_i32_1 : i32, i32, i32
  }
  func.func @transform_15(%arg0: i32) -> (i32, i32, i32) {
    %c0_i32 = arith.constant 0 : i32
    %c0_i32_0 = arith.constant 0 : i32
    %c0_i32_1 = arith.constant 0 : i32
    %c0_i32_2 = arith.constant 0 : i32
    return %c0_i32, %c0_i32_0, %c0_i32_1 : i32, i32, i32
  }
  func.func @transform_16(%arg0: i32) -> (i32, i32) {
    %c0_i32 = arith.constant 0 : i32
    %c0_i32_0 = arith.constant 0 : i32
    %c0_i32_1 = arith.constant 0 : i32
    return %c0_i32, %c0_i32_0 : i32, i32
  }
}

</mosaic_0001>

<bundles_post_ra>
// kernel: performer_encoder_forward.1
= control target key start
LH: loop header
LB: loop body
LE: loop exit
PB: predicated region body
PF: predicated region fallthrough
CT: control target
= control target key end

     0   :  { %s4868_s0 = inlined_call_operand.vmem [shape: f32[16,32], index: 0, kind: input, shape index: {}]   ;;  %s4869_s1 = inlined_call_operand.vmem [shape: f32[32,32], index: 1, kind: input, shape index: {}]   ;;  %s4870_s2 = inlined_call_operand.vmem [shape: f32[128,64], index: 2, kind: input, shape index: {}]   ;;  %s4871_s3 = inlined_call_operand.vmem [shape: f32[1,64], index: 3, kind: input, shape index: {}]   ;;  %s4872_s4 = inlined_call_operand.vmem [shape: f32[64,128], index: 4, kind: input, shape index: {}]   ;;  %s4873_s5 = inlined_call_operand.vmem [shape: f32[2,32,64], index: 5, kind: input, shape index: {}]   ;;  %s4874_s6 = inlined_call_operand.vmem [shape: f32[2,32,64], index: 6, kind: input, shape index: {}]   ;;  %s4875_s7 = inlined_call_operand.vmem [shape: f32[2,64,128], index: 7, kind: input, shape index: {}]   ;;  %s4876_s8 = inlined_call_operand.vmem [shape: f32[2,1,32], index: 8, kind: input, shape index: {}]   ;;  %s4877_s9 = inlined_call_operand.vmem [shape: f32[2,1,32], index: 9, kind: input, shape index: {}]   ;;  %s4878_s10 = inlined_call_operand.vmem [shape: f32[2,32,64], index: 10, kind: input, shape index: {}]   ;;  %s4879_s11 = inlined_call_operand.vmem [shape: f32[2,1,64], index: 11, kind: input, shape index: {}]   ;;  %s4880_s12 = inlined_call_operand.vmem [shape: f32[2,64,32], index: 12, kind: input, shape index: {}]   ;;  %s4881_s13 = inlined_call_operand.vmem [shape: f32[2,1,32], index: 13, kind: input, shape index: {}]   ;;  %s4882_s14 = inlined_call_operand.vmem [shape: f32[2,1,32], index: 14, kind: input, shape index: {}]   ;;  %s4883_s15 = inlined_call_operand.vmem [shape: f32[2,1,32], index: 15, kind: input, shape index: {}]   ;;  %s4884_s16 = inlined_call_operand.hbm [shape: f32[16,32], index: 16, kind: output, shape index: {}]  }
   0x1   :  { %4886 = sst [smem:[#allocation5_spill]] %s4868_s0 }
   0x2   :  { %v134_v0 = vld [vmem:[%s4873_s5] sm:$0xff]  ;;  %v135_v1 = vld [vmem:[%s4873_s5 + $0x8] sm:$0xff]  ;;  %v136_v2 = vld [vmem:[%s4873_s5 + $0x10] sm:$0xff]  ;;  %vm138_vm0 = vcmask 261120   ;;  %s4887_s0 = sld [smem:[#allocation5_spill]] }
   0x3   :  { %v3621_v3 = vpack.c.bf16 %v135_v1, %v134_v0  ;;  %v137_v4 = vld [vmem:[%s4873_s5 + $0x18] sm:$0xff]  ;;  %v220_v7 = vld [vmem:[%s4874_s6] sm:$0xff]  ;;  %v221_v8 = vld [vmem:[%s4874_s6 + $0x8] sm:$0xff] }
   0x4   :  { %v3625_v6 = vpack.c.bf16 %v137_v4, %v136_v2  ;;  %v222_v9 = vld [vmem:[%s4874_s6 + $0x10] sm:$0xff]  ;;  %v3629_v10 = vpack.c.bf16 %v221_v8, %v220_v7  ;;  %v223_v11 = vld [vmem:[%s4874_s6 + $0x18] sm:$0xff]  ;;  %v305_v12 = vld [vmem:[%s4875_s7] sm:$0xff] }
   0x5   :  { %3622 = vmatprep.subr.bf16.mxu0 %v3621_v3  ;;  %v306_v13 = vld [vmem:[%s4875_s7 + $0x8] sm:$0xff]  ;;  %v3633_v14 = vpack.c.bf16 %v223_v11, %v222_v9  ;;  %v75_v15 = vld [vmem:[%s4872_s4] sm:$0xff]  ;;  %v307_v18 = vld [vmem:[%s4875_s7 + $0x10] sm:$0xff] }
   0x6   :  { %3624 = vmatpush3.bf16.msra.mxu0 %v3621_v3  ;;  %v76_v16 = vld [vmem:[%s4872_s4 + $0x8] sm:$0xff]  ;;  %3630 = vmatprep.subr.bf16.mxu1 %v3629_v10  ;;  %v3637_v17 = vpack.c.bf16 %v306_v13, %v305_v12  ;;  %v308_v19 = vld [vmem:[%s4875_s7 + $0x18] sm:$0xff]  ;;  %v77_v22 = vld [vmem:[%s4872_s4 + $0x10] sm:$0xff] }
   0x7   :  { %3626 = vmatprep.subr.bf16.mxu0 %v3625_v6  ;;  %3632 = vmatpush3.bf16.msra.mxu1 %v3629_v10  ;;  %v4117_v21 = vpack.c.bf16 %v76_v16, %v75_v15  ;;  %v78_v23 = vld [vmem:[%s4872_s4 + $0x18] sm:$0xff] }
   0x8   :  { %v4076_v5 = vld [vmem:[%s4887_s0] sm:$0xff]  ;;  %v4115_v20 = vld [vmem:[%s4887_s0 + $0x8] sm:$0xff]  ;;  %3634 = vmatprep.subr.bf16.mxu1 %v3633_v14 }
   0x9   :  { %3235 = vmatprep.mubr.msk.f32.mxu0 %vm138_vm0, %v4076_v5  ;;  %3246 = vmatprep.mubr.msk.f32.mxu1 %vm138_vm0, %v4076_v5 }
   0xa   :  { %3628 = vmatpush3.bf16.msra.mxu0 %v3625_v6 }
   0xb   :  { %21 = vsyncpa [#allocation3], 0  ;;  %3638 = vmatprep.subr.bf16.mxu0 %v3637_v17  ;;  %v3641_v24 = vpack.c.bf16 %v308_v19, %v307_v18  ;;  %3636 = vmatpush3.bf16.msra.mxu1 %v3633_v14  ;;  %v309_v25 = vld [vmem:[%s4875_s7 + $0x20] sm:$0xff]  ;;  %v310_v26 = vld [vmem:[%s4875_s7 + $0x28] sm:$0xff]  ;;  %v4134_v27 = vpack.c.bf16 %v78_v23, %v77_v22  ;;  %vm313_vm1 = vcmask 523264   ;;  %v83_v48 = vlaneseq  ;;  %s3972_s23 = smov 96  }
   0xc   :  { %3654 = vmatprep.subr.bf16.mxu1 %v4117_v21  ;;  %v79_v28 = vld [vmem:[%s4872_s4 + $0x20] sm:$0xff]  ;;  %v80_v29 = vld [vmem:[%s4872_s4 + $0x28] sm:$0xff]  ;;  %v3645_v30 = vpack.c.bf16 %v310_v26, %v309_v25  ;;  %v311_v31 = vld [vmem:[%s4875_s7 + $0x30] sm:$0xff]  ;;  %s3973_s24 = smov [#allocation2]  }
   0xd   :  { %3236 = vmatmul.mubr.msk.f32.vlgmr.msra.gmra.mrb[0].mxu0 %vm138_vm0, %v4115_v20  ;;  %v312_v32 = vld [vmem:[%s4875_s7 + $0x38] sm:$0xff]  ;;  %v4152_v33 = vpack.c.bf16 %v80_v29, %v79_v28  ;;  %v81_v35 = vld [vmem:[%s4872_s4 + $0x30] sm:$0xff]  ;;  %v4174_v43 = vld [vmem:[%s4871_s3] ss:$0 sm:$0xff]  ;;  %v4178_v49 = vand.u32 127, %v83_v48  ;;  %s3971_s3 = smov 64  }
   0xe   :  { %3640 = vmatpush3.bf16.msra.mxu0 %v3637_v17  ;;  %3247 = vmatmul.mubr.msk.f32.vlgmr.msra.gmra.mrb[0].mxu1 %vm138_vm0, %v4115_v20  ;;  %v3649_v34 = vpack.c.bf16 %v312_v32, %v311_v31  ;;  %v82_v36 = vld [vmem:[%s4872_s4 + $0x38] sm:$0xff]  ;;  %s2877_s25 = sshll.u32 %s3973_s24, 4  ;;  %s2878_s25 = int_to_ptr.vmem [resolvable:$true] %s2877_s25 }
   0xf   :  { %3642 = vmatprep.subr.bf16.mxu0 %v3641_v24  ;;  %3656 = vmatpush3.bf16.msra.mxu1 %v4117_v21  ;;  %v4163_v37 = vpack.c.bf16 %v82_v36, %v81_v35  ;;  %vm94_vm2 = vcmp.ge.s32.totalorder %v4178_v49, 32  ;;  %vm95_vm3 = vcmp.lt.s32.totalorder %v4178_v49, 48  ;;  %vm89_vm5 = vcmp.lt.s32.totalorder %v4178_v49, 16  ;;  %p3952_p1 = scmp.lt.s32.totalorder %s2878_s25, %s2878_s25 }
  0x10   :  { %3658 = vmatprep.subr.bf16.mxu1 %v4134_v27  ;;  %vm4182_vm4 = vmand %vm94_vm2, %vm95_vm3  ;;  %vm97_vm6 = vcmp.ge.s32.totalorder %v4178_v49, 48  ;;  %vm98_vm7 = vcmp.lt.s32.totalorder %v4178_v49, 64  ;;  %vm91_vm8 = vcmp.ge.s32.totalorder %v4178_v49, 16  ;;  %vm92_vm9 = vcmp.lt.s32.totalorder %v4178_v49, 32 }
  0x11   :  { %vm4205_vm10 = vmand %vm97_vm6, %vm98_vm7  ;;  %vm103_vm12 = vcmp.ge.s32.totalorder %v4178_v49, 80  ;;  %vm104_vm13 = vcmp.lt.s32.totalorder %v4178_v49, 96  ;;  %vm100_vm14 = vcmp.ge.s32.totalorder %v4178_v49, 64  ;;  %vm101_vm15 = vcmp.lt.s32.totalorder %v4178_v49, 80 }
  0x12   :  { %3644 = vmatpush3.bf16.msra.mxu0 %v3641_v24  ;;  %vm4213_vm11 = vmand %vm91_vm8, %vm92_vm9  ;;  %vm106_vm6 = vcmp.ge.s32.totalorder %v4178_v49, 96  ;;  %vm107_vm8 = vcmp.lt.s32.totalorder %v4178_v49, 112  ;;  %vm109_vm9 = vcmp.ge.s32.totalorder %v4178_v49, 112 }
  0x13   :  { %3646 = vmatprep.subr.bf16.mxu0 %v3645_v30  ;;  %3660 = vmatpush3.bf16.msra.mxu1 %v4134_v27  ;;  %vm4229_vm2 = vmand %vm103_vm12, %vm104_vm13  ;;  %vm634_vm13 = vcmask 130048  }
  0x14   :  { %3662 = vmatprep.subr.bf16.mxu1 %v4152_v33  ;;  %vm4235_vm3 = vmand %vm100_vm14, %vm101_vm15 }
  0x15   :  { %vm4248_vm12 = vmand %vm106_vm6, %vm107_vm8 }
  0x16   :  { %3648 = vmatpush3.bf16.msra.mxu0 %v3645_v30 }
  0x17   :  { %3650 = vmatprep.subr.bf16.mxu0 %v3649_v34  ;;  %3664 = vmatpush3.bf16.msra.mxu1 %v4152_v33 }
  0x18   :  { %3666 = vmatprep.subr.bf16.mxu1 %v4163_v37 }
  0x1a   :  { %3652 = vmatpush3.bf16.msra.mxu0 %v3649_v34 }
  0x1b   :  { %3668 = vmatpush3.bf16.msra.mxu1 %v4163_v37 }
  0xe0   :  { %v3237_v38 = vpop.f32.mrb[0].mxu0 }
  0xe1   :  { %v211_v39 = vpop.f32.mrb[1].mxu0  ;;  %v3248_v41 = vpop.f32.mrb[0].mxu1  ;;  %v396_v42 = vmul.f32 %v3237_v38, %v3237_v38 }
  0xe2   :  { %v395_v40 = vmul.f32 %v211_v39, %v211_v39  ;;  %3265 = vmatprep.mubr.msk.f32.mxu0 %vm313_vm1, %v211_v39  ;;  %v302_v44 = vadd.f32 %v3248_v41, %v4174_v43  ;;  %v296_v45 = vpop.f32.mrb[1].mxu1 }
  0xe3   :  { %3266 = vmatmul.mubr.msk.f32.vlgmr.msra.gmra.mrb[2].mxu0 %vm313_vm1, %v3237_v38  ;;  %v297_v46 = vadd.f32 %v4174_v43, %v296_v45 }
  0xe4   :  { %3284 = vmatprep.mubr.msk.f32.mxu1 %vm313_vm1, %v395_v40 }
  0xe5   :  { %3285 = vmatmul.mubr.msk.f32.vlgmr.msra.gmra.mrb[2].mxu1 %vm313_vm1, %v396_v42  ;;  %v3669_v47 = vpack.c.bf16 %v302_v44, %v297_v46 }
  0xe7   :  { %3670 = vmatprep.subr.bf16.mxu0 %v3669_v47 }
  0xe8   :  { %3672 = vmatpush3.bf16.msra.mxu0 %v3669_v47 }
 0x1b6   :  { %v4189_v51 = vpop.f32.mrb[2].mxu0 }
 0x1b7   :  { %v4193_v52 = vpop.f32.mrb[3].mxu0  ;;  %v489_v7 = vsel %vm4213_vm11, %v4189_v51, -inf  ;;  %v481_v8 = vsel %vm89_vm5, %v4189_v51, -inf  ;;  %v509_v9 = vsel %vm4205_vm10, %v4189_v51, -inf  ;;  %v499_v10 = vsel %vm4182_vm4, %v4189_v51, -inf }
 0x1b8   :  { %v4195_v53 = vpop.f32.mrb[2].mxu1  ;;  %v498_v54 = vsel %vm4182_vm4, %v4193_v52, -inf  ;;  %v480_v55 = vsel %vm89_vm5, %v4193_v52, -inf  ;;  %v508_v61 = vsel %vm4205_vm10, %v4193_v52, -inf  ;;  %v488_v62 = vsel %vm4213_vm11, %v4193_v52, -inf }
 0x1b9   :  { %v579_v57 = vsub.f32 %v4189_v51, %v4195_v53  ;;  %500 = vmax.xlane.f32.xlu1 %v498_v54  ;;  %482 = vmax.xlane.f32.xlu0 %v480_v55  ;;  %v4211_v58 = vpop.f32.mrb[3].mxu1  ;;  %v528_v1 = vsel %vm4229_vm2, %v4193_v52, -inf  ;;  %v518_v2 = vsel %vm4235_vm3, %v4193_v52, -inf  ;;  %v548_v4 = vsel %vm109_vm9, %v4193_v52, -inf }
 0x1ba   :  { %v578_v60 = vsub.f32 %v4193_v52, %v4211_v58  ;;  %v538_v6 = vsel %vm4248_vm12, %v4193_v52, -inf  ;;  %v529_v11 = vsel %vm4229_vm2, %v4189_v51, -inf  ;;  %v519_v12 = vsel %vm4235_vm3, %v4189_v51, -inf }
 0x1bb   :  { %v549_v13 = vsel %vm109_vm9, %v4189_v51, -inf  ;;  %v539_v14 = vsel %vm4248_vm12, %v4189_v51, -inf }
 0x1bd   :  { %510 = vmax.xlane.f32.xlu1 %v508_v61  ;;  %490 = vmax.xlane.f32.xlu0 %v488_v62 }
 0x1c1   :  { %530 = vmax.xlane.f32.xlu1 %v528_v1  ;;  %520 = vmax.xlane.f32.xlu0 %v518_v2 }
 0x1c5   :  { %550 = vmax.xlane.f32.xlu1 %v548_v4  ;;  %540 = vmax.xlane.f32.xlu0 %v538_v6 }
 0x1c9   :  { %492 = vmax.xlane.f32.xlu1 %v489_v7  ;;  %484 = vmax.xlane.f32.xlu0 %v481_v8 }
 0x1cd   :  { %512 = vmax.xlane.f32.xlu1 %v509_v9  ;;  %502 = vmax.xlane.f32.xlu0 %v499_v10 }
 0x1d1   :  { %532 = vmax.xlane.f32.xlu1 %v529_v11  ;;  %522 = vmax.xlane.f32.xlu0 %v519_v12 }
 0x1d5   :  { %552 = vmax.xlane.f32.xlu1 %v549_v13  ;;  %542 = vmax.xlane.f32.xlu0 %v539_v14 }
 0x246   :  { %v501_v15 = vpop.xlane.xlu1 %500  ;;  %v483_v16 = vpop.xlane.xlu0 %482 }
 0x24a   :  { %v511_v17 = vpop.xlane.xlu1 %510  ;;  %v491_v18 = vpop.xlane.xlu0 %490 }
 0x24b   :  { %v494_v19 = vsel %vm4213_vm11, %v491_v18, %v483_v16 }
 0x24c   :  { %v504_v22 = vsel %vm4182_vm4, %v501_v15, %v494_v19 }
 0x24d   :  { %v514_v23 = vsel %vm4205_vm10, %v511_v17, %v504_v22 }
 0x24e   :  { %v531_v24 = vpop.xlane.xlu1 %530  ;;  %v521_v25 = vpop.xlane.xlu0 %520 }
 0x24f   :  { %v524_v26 = vsel %vm4235_vm3, %v521_v25, %v514_v23 }
 0x250   :  { %v534_v29 = vsel %vm4229_vm2, %v531_v24, %v524_v26 }
 0x252   :  { %v551_v28 = vpop.xlane.xlu1 %550  ;;  %v541_v30 = vpop.xlane.xlu0 %540 }
 0x253   :  { %v544_v31 = vsel %vm4248_vm12, %v541_v30, %v534_v29 }
 0x254   :  { %v554_v32 = vsel %vm109_vm9, %v551_v28, %v544_v31 }
 0x255   :  { %v559_v34 = vrot.slane %v554_v32, 4 }
 0x256   :  { %v493_v35 = vpop.xlane.xlu1 %492  ;;  %v485_v36 = vpop.xlane.xlu0 %484 }
 0x257   :  { %v560_v38 = vmax.f32 %v554_v32, %v559_v34  ;;  %v495_v40 = vsel %vm4213_vm11, %v493_v35, %v485_v36 }
 0x259   :  { %v561_v39 = vrot.slane %v560_v38, 2 }
 0x25a   :  { %v513_v41 = vpop.xlane.xlu1 %512  ;;  %v503_v42 = vpop.xlane.xlu0 %502 }
 0x25b   :  { %v562_v44 = vmax.f32 %v560_v38, %v561_v39  ;;  %v505_v45 = vsel %vm4182_vm4, %v503_v42, %v495_v40 }
 0x25c   :  { %v515_v48 = vsel %vm4205_vm10, %v513_v41, %v505_v45  ;;  %v4352_v45 = vld [vmem:[%s4870_s2] sm:$0xff] }
 0x25d   :  { %v563_v46 = vrot.slane %v562_v44, 1 }
 0x25e   :  { %v533_v47 = vpop.xlane.xlu1 %532  ;;  %v523_v54 = vpop.xlane.xlu0 %522 }
 0x25f   :  { %v564_v55 = vmax.f32 %v562_v44, %v563_v46  ;;  %v525_v61 = vsel %vm4235_vm3, %v523_v54, %v515_v48  ;;  %v4347_v44 = vld [vmem:[%s4870_s2 + $0x8] sm:$0xff] }
 0x260   :  { %v535_v4 = vsel %vm4229_vm2, %v533_v47, %v525_v61  ;;  %v4359_v61 = vld [vmem:[%s4870_s2 + $0x18] sm:$0xff] }
 0x261   :  { %v576_v62 = vsel %vm98_vm7, %v554_v32, %v564_v55 }
 0x262   :  { %v580_v1 = vsub.f32 %v578_v60, %v576_v62  ;;  %v553_v2 = vpop.xlane.xlu1 %552  ;;  %v543_v6 = vpop.xlane.xlu0 %542  ;;  %v4364_v62 = vld [vmem:[%s4870_s2 + $0x10] sm:$0xff] }
 0x263   :  { %v545_v7 = vsel %vm4248_vm12, %v543_v6, %v535_v4 }
 0x264   :  { %v555_v8 = vsel %vm109_vm9, %v553_v2, %v545_v7  ;;  %v582_v9 = vadd.f32 -1.3862944, %v580_v1 }
 0x265   :  { %v568_v10 = vrot.slane %v555_v8, 4 }
 0x266   :  { %v584_v11 = vmul.f32 1.442695, %v582_v9  ;;  %v4376_v9 = vld [vmem:[%s4870_s2 + $0x20] sm:$0xff] }
 0x267   :  { %v569_v12 = vmax.f32 %v555_v8, %v568_v10 }
 0x268   :  { %3907 = vpow2.f32 %v584_v11 }
 0x269   :  { %v570_v13 = vrot.slane %v569_v12, 2 }
 0x26b   :  { %v571_v14 = vmax.f32 %v569_v12, %v570_v13 }
 0x26d   :  { %v572_v52 = vrot.slane %v571_v14, 1 }
 0x26f   :  { %v573_v58 = vmax.f32 %v571_v14, %v572_v52  ;;  %v4383_v52 = vld [vmem:[%s4870_s2 + $0x38] sm:$0xff] }
 0x271   :  { %v577_v60 = vsel %vm98_vm7, %v555_v8, %v573_v58  ;;  %v4371_v8 = vld [vmem:[%s4870_s2 + $0x28] sm:$0xff]  ;;  %v4388_v58 = vld [vmem:[%s4870_s2 + $0x30] sm:$0xff] }
 0x272   :  { %v3908_v15 = vpop.eup %3907  ;;  %v581_v16 = vsub.f32 %v579_v57, %v577_v60 }
 0x273   :  { %v588_v17 = vadd.f32 2.5e-05, %v3908_v15 }
 0x274   :  { %v583_v18 = vadd.f32 -1.3862944, %v581_v16 }
 0x275   :  { %590 = vrot.lane.b32.xlu0 %v588_v17, %s3971_s3  ;;  %3347 = vmatprep.mubr.msk.f32.mxu1 %vm98_vm7, %v588_v17 }
 0x276   :  { %v586_v19 = vmul.f32 1.442695, %v583_v18 }
 0x278   :  { %3909 = vpow2.f32 %v586_v19  ;;  %v4395_v19 = vld [vmem:[%s4870_s2 + $0x48] sm:$0xff] }
 0x282   :  { %v3910_v22 = vpop.eup %3909 }
 0x283   :  { %v589_v23 = vadd.f32 2.5e-05, %v3910_v22  ;;  %v4400_v22 = vld [vmem:[%s4870_s2 + $0x40] sm:$0xff] }
 0x285   :  { %592 = vrot.lane.b32.xlu0 %v589_v23, %s3971_s3  ;;  %v599_v51 = vsel %vm100_vm14, %v589_v23, 0.0 }
 0x2e7   :  { %v591_v24 = vpop.permute.xlu0 %590 }
 0x2e8   :  { %v600_v25 = vsel %vm98_vm7, %v591_v24, 0.0 }
 0x2e9   :  { %602 = vxpose.xlu1.b32.start [1/2] (short) %v600_v25, 128 }
 0x2ed   :  { %603 = vxpose.xlu1.b32.end [2/2] (short) %v599_v51, 128 }
 0x369   :  { %v618_v53 = vpop.trf.xlu1 }
 0x36a   :  { %3291 = vmatprep.mubr.msk.f32.mxu0 %vm634_vm13, %v618_v53 }
 0x36d   :  { %v619_v57 = vpop.trf.xlu1 }
 0x36e   :  { %3292 = vmatmul.mubr.msk.f32.vlgmr.msra.gmra.mrb[4].mxu0 %vm634_vm13, %v619_v57  ;;  %v4407_v57 = vld [vmem:[%s4870_s2 + $0x58] sm:$0xff] }
 0x371   :  { %v620_v26 = vpop.trf.xlu1 }
 0x372   :  { %3294 = vmatprep.mubr.msk.f32.mxu0 %vm634_vm13, %v620_v26  ;;  %v4412_v26 = vld [vmem:[%s4870_s2 + $0x50] sm:$0xff] }
 0x375   :  { %v621_v28 = vpop.trf.xlu1 }
 0x376   :  { %3295 = vmatmul.mubr.msk.f32.gmra.mrb[6].mxu0 %vm634_vm13, %v621_v28 }
 0x379   :  { %v622_v29 = vpop.trf.xlu1 }
 0x37a   :  { %3297 = vmatprep.mubr.msk.f32.mxu0 %vm634_vm13, %v622_v29 }
 0x37d   :  { %v623_v30 = vpop.trf.xlu1 }
 0x37e   :  { %3298 = vmatmul.mubr.msk.f32.gmra.mrb[8].mxu0 %vm634_vm13, %v623_v30 }
 0x381   :  { %v624_v31 = vpop.trf.xlu1 }
 0x382   :  { %3300 = vmatprep.mubr.msk.f32.mxu0 %vm634_vm13, %v624_v31 }
 0x385   :  { %v625_v32 = vpop.trf.xlu1 }
 0x386   :  { %3301 = vmatmul.mubr.msk.f32.gmra.mrb[10].mxu0 %vm634_vm13, %v625_v32 }
 0x389   :  { %v626_v34 = vpop.trf.xlu1 }
 0x38a   :  { %3303 = vmatprep.mubr.msk.f32.mxu0 %vm634_vm13, %v626_v34  ;;  %v4419_v34 = vld [vmem:[%s4870_s2 + $0x68] sm:$0xff] }
 0x38d   :  { %v627_v35 = vpop.trf.xlu1 }
 0x38e   :  { %3304 = vmatmul.mubr.msk.f32.gmra.mrb[12].mxu0 %vm634_vm13, %v627_v35  ;;  %v4424_v35 = vld [vmem:[%s4870_s2 + $0x60] sm:$0xff] }
 0x391   :  { %v628_v36 = vpop.trf.xlu1 }
 0x392   :  { %3306 = vmatprep.mubr.msk.f32.mxu0 %vm634_vm13, %v628_v36 }
 0x395   :  { %v629_v38 = vpop.trf.xlu1 }
 0x396   :  { %3307 = vmatmul.mubr.msk.f32.gmra.mrb[14].mxu0 %vm634_vm13, %v629_v38 }
 0x399   :  { %v630_v39 = vpop.trf.xlu1 }
 0x39a   :  { %3309 = vmatprep.mubr.msk.f32.mxu0 %vm634_vm13, %v630_v39 }
 0x39d   :  { %v631_v40 = vpop.trf.xlu1 }
 0x39e   :  { %3310 = vmatmul.mubr.msk.f32.gmra.mrb[16].mxu0 %vm634_vm13, %v631_v40 }
 0x3a1   :  { %v632_v41 = vpop.trf.xlu1 }
 0x3a2   :  { %3312 = vmatprep.mubr.msk.f32.mxu0 %vm634_vm13, %v632_v41 }
 0x3a5   :  { %v633_v42 = vpop.trf.xlu1 }
 0x3a6   :  { %3313 = vmatmul.mubr.msk.f32.gmra.mrb[18].mxu0 %vm634_vm13, %v633_v42  ;;  %v4431_v42 = vld [vmem:[%s4870_s2 + $0x78] sm:$0xff] }
 0x441   :  { %v3293_v46 = vpop.f32.mrb[4].mxu0 }
 0x442   :  { %v829_v47 = vmul.f32 %v3293_v46, %v4347_v44  ;;  %v749_v48 = vpop.f32.mrb[5].mxu0  ;;  %v4436_v46 = vld [vmem:[%s4870_s2 + $0x70] sm:$0xff] }
 0x443   :  { %v828_v54 = vmul.f32 %v749_v48, %v4352_v45 }
 0x445   :  { %v3673_v55 = vpack.c.bf16 %v829_v47, %v828_v54 }
 0x447   :  { %3674 = vmatprep.subr.bf16.mxu1 %v3673_v55 }
 0x448   :  { %3676 = vmatpush3.bf16.msra.mxu1 %v3673_v55 }
 0x449   :  { %v3296_v1 = vpop.f32.mrb[6].mxu0 }
 0x44a   :  { %v831_v2 = vmul.f32 %v3296_v1, %v4359_v61  ;;  %v759_v4 = vpop.f32.mrb[7].mxu0 }
 0x44b   :  { %v830_v6 = vmul.f32 %v759_v4, %v4364_v62  ;;  %v54_v4 = vld [vmem:[%s4869_s1] sm:$0xff] }
 0x44d   :  { %v3677_v7 = vpack.c.bf16 %v831_v2, %v830_v6  ;;  %v593_v2 = vpop.permute.xlu0 %592  ;;  %v55_v6 = vld [vmem:[%s4869_s1 + $0x8] sm:$0xff] }
 0x44f   :  { %3678 = vmatprep.subr.bf16.mxu1 %v3677_v7 }
 0x450   :  { %3680 = vmatpush3.bf16.msra.mxu1 %v3677_v7  ;;  %v4448_v7 = vpack.c.bf16 %v55_v6, %v54_v4  ;;  %v2920_v6 = vld [vmem:[%s4877_s9] ss:$0 sm:$0xff] }
 0x451   :  { %v3299_v10 = vpop.f32.mrb[8].mxu0 }
 0x452   :  { %v833_v11 = vmul.f32 %v3299_v10, %v4371_v8  ;;  %v769_v12 = vpop.f32.mrb[9].mxu0  ;;  %3706 = vmatprep.subr.bf16.mxu0 %v4448_v7  ;;  %v56_v10 = vld [vmem:[%s4869_s1 + $0x10] sm:$0xff] }
 0x453   :  { %v832_v13 = vmul.f32 %v769_v12, %v4376_v9  ;;  %3708 = vmatpush3.bf16.msra.mxu0 %v4448_v7 }
 0x455   :  { %v3681_v14 = vpack.c.bf16 %v833_v11, %v832_v13  ;;  %v57_v11 = vld [vmem:[%s4869_s1 + $0x18] sm:$0xff] }
 0x456   :  { %v4460_v12 = vpack.c.bf16 %v57_v11, %v56_v10 }
 0x457   :  { %3682 = vmatprep.subr.bf16.mxu1 %v3681_v14 }
 0x458   :  { %3684 = vmatpush3.bf16.msra.mxu1 %v3681_v14  ;;  %3710 = vmatprep.subr.bf16.mxu0 %v4460_v12 }
 0x459   :  { %v3302_v60 = vpop.f32.mrb[10].mxu0  ;;  %3712 = vmatpush3.bf16.msra.mxu0 %v4460_v12 }
 0x45a   :  { %v835_v15 = vmul.f32 %v3302_v60, %v4383_v52  ;;  %v779_v16 = vpop.f32.mrb[11].mxu0 }
 0x45b   :  { %v834_v17 = vmul.f32 %v779_v16, %v4388_v58 }
 0x45d   :  { %v3685_v18 = vpack.c.bf16 %v835_v15, %v834_v17 }
 0x45f   :  { %3686 = vmatprep.subr.bf16.mxu1 %v3685_v18 }
 0x460   :  { %3688 = vmatpush3.bf16.msra.mxu1 %v3685_v18 }
 0x461   :  { %v3305_v23 = vpop.f32.mrb[12].mxu0 }
 0x462   :  { %v837_v24 = vmul.f32 %v3305_v23, %v4395_v19  ;;  %v789_v25 = vpop.f32.mrb[13].mxu0 }
 0x463   :  { %v836_v51 = vmul.f32 %v789_v25, %v4400_v22 }
 0x465   :  { %v3689_v53 = vpack.c.bf16 %v837_v24, %v836_v51 }
 0x467   :  { %3690 = vmatprep.subr.bf16.mxu1 %v3689_v53 }
 0x468   :  { %3692 = vmatpush3.bf16.msra.mxu1 %v3689_v53 }
 0x469   :  { %v3308_v28 = vpop.f32.mrb[14].mxu0 }
 0x46a   :  { %v839_v29 = vmul.f32 %v3308_v28, %v4407_v57  ;;  %v799_v30 = vpop.f32.mrb[15].mxu0 }
 0x46b   :  { %v838_v31 = vmul.f32 %v799_v30, %v4412_v26  ;;  %v1121_v30 = vld [vmem:[%s4878_s10] sm:$0xff] }
 0x46d   :  { %v3693_v32 = vpack.c.bf16 %v839_v29, %v838_v31  ;;  %v1122_v31 = vld [vmem:[%s4878_s10 + $0x8] sm:$0xff] }
 0x46f   :  { %3694 = vmatprep.subr.bf16.mxu1 %v3693_v32 }
 0x470   :  { %3696 = vmatpush3.bf16.msra.mxu1 %v3693_v32  ;;  %v1123_v32 = vld [vmem:[%s4878_s10 + $0x10] sm:$0xff] }
 0x471   :  { %v3311_v36 = vpop.f32.mrb[16].mxu0 }
 0x472   :  { %v841_v38 = vmul.f32 %v3311_v36, %v4419_v34  ;;  %v809_v39 = vpop.f32.mrb[17].mxu0  ;;  %v3721_v36 = vpack.c.bf16 %v1122_v31, %v1121_v30  ;;  %v2921_v30 = vld [vmem:[%s4879_s11] ss:$0 sm:$0xff] }
 0x473   :  { %v840_v40 = vmul.f32 %v809_v39, %v4424_v35 }
 0x474   :  { %3722 = vmatprep.subr.bf16.mxu0 %v3721_v36 }
 0x475   :  { %v3697_v41 = vpack.c.bf16 %v841_v38, %v840_v40  ;;  %v1124_v38 = vld [vmem:[%s4878_s10 + $0x18] sm:$0xff] }
 0x476   :  { %v3725_v39 = vpack.c.bf16 %v1124_v38, %v1123_v32 }
 0x477   :  { %3698 = vmatprep.subr.bf16.mxu1 %v3697_v41 }
 0x478   :  { %3700 = vmatpush3.bf16.msra.mxu1 %v3697_v41 }
 0x479   :  { %v3314_v47 = vpop.f32.mrb[18].mxu0 }
 0x47a   :  { %v843_v48 = vmul.f32 %v3314_v47, %v4431_v42  ;;  %v819_v54 = vpop.f32.mrb[19].mxu0 }
 0x47b   :  { %v842_v55 = vmul.f32 %v819_v54, %v4436_v46 }
 0x47d   :  { %v3701_v1 = vpack.c.bf16 %v843_v48, %v842_v55  ;;  %v2919_v55 = vld [vmem:[%s4876_s8] ss:$0 sm:$0xff] }
 0x47f   :  { %3702 = vmatprep.subr.bf16.mxu1 %v3701_v1 }
 0x480   :  { %3704 = vmatpush3.bf16.msra.mxu1 %v3701_v1 }
 0x481   :  { %3714 = vmatprep.subr.bf16.mxu1 %v4448_v7 }
 0x483   :  { %3348 = vmatmul.mubr.msk.f32.vlgmr.msra.gmra.mrb[4].mxu1 %vm100_vm14, %v593_v2 }
 0x484   :  { %3716 = vmatpush3.bf16.msra.mxu1 %v4448_v7 }
 0x485   :  { %3718 = vmatprep.subr.bf16.mxu1 %v4460_v12 }
 0x488   :  { %3720 = vmatpush3.bf16.msra.mxu1 %v4460_v12 }
 0x556   :  { %v3349_v13 = vpop.f32.mrb[4].mxu1 }
 0x557   :  { %v910_v14 = vpop.f32.mrb[5].mxu1 }
 0x558   :  { %921 = vrot.lane.b32.xlu0 %v910_v14, %s3972_s23 }
 0x55c   :  { %923 = vrot.lane.b32.xlu0 %v3349_v13, %s3972_s23 }
 0x5ca   :  { %v922_v60 = vpop.permute.xlu0 %921 }
 0x5cb   :  { %3911 = vrcp.f32 %v922_v60 }
 0x5ce   :  { %v924_v15 = vpop.permute.xlu0 %923 }
 0x5cf   :  { %3913 = vrcp.f32 %v924_v15 }
 0x5d5   :  { %v3912_v16 = vpop.eup %3911 }
 0x5d6   :  { %v928_v17 = vmul.f32 %v3912_v16, %v910_v14 }
 0x5d8   :  { %3358 = vmatprep.mubr.msk.f32.mxu0 %vm138_vm0, %v928_v17 }
 0x5d9   :  { %v3914_v18 = vpop.eup %3913 }
 0x5da   :  { %v930_v23 = vmul.f32 %v3914_v18, %v3349_v13  ;;  %v1226_v18 = vld [vmem:[%s4880_s12 + $0x18] sm:$0xff] }
 0x5dc   :  { %3359 = vmatmul.mubr.msk.f32.vlgmr.msra.gmra.mrb[20].mxu0 %vm138_vm0, %v930_v23 }
 0x5dd   :  { %3724 = vmatpush3.bf16.msra.mxu0 %v3721_v36 }
 0x5de   :  { %3726 = vmatprep.subr.bf16.mxu0 %v3725_v39 }
 0x5e1   :  { %3728 = vmatpush3.bf16.msra.mxu0 %v3725_v39 }
 0x5e2   :  { %3746 = vmatprep.subr.bf16.mxu0 %v4448_v7 }
 0x6af   :  { %v3360_v24 = vpop.f32.mrb[20].mxu0 }
 0x6b0   :  { %v1015_v25 = vsub.f32 %v930_v23, %v3360_v24  ;;  %v1005_v51 = vpop.f32.mrb[21].mxu0  ;;  %v1227_v24 = vld [vmem:[%s4880_s12 + $0x20] sm:$0xff] }
 0x6b1   :  { %v1014_v53 = vsub.f32 %v928_v17, %v1005_v51  ;;  %v1225_v17 = vld [vmem:[%s4880_s12 + $0x10] sm:$0xff] }
 0x6b2   :  { %v1017_v29 = vmul.f32 %v1015_v25, %v1015_v25  ;;  %v3733_v23 = vpack.c.bf16 %v1226_v18, %v1225_v17 }
 0x6b3   :  { %v1016_v28 = vmul.f32 %v1014_v53, %v1014_v53 }
 0x6b5   :  { %3369 = vmatprep.mubr.msk.f32.mxu1 %vm138_vm0, %v1016_v28  ;;  %v1230_v28 = vld [vmem:[%s4880_s12 + $0x38] sm:$0xff] }
 0x6b6   :  { %3370 = vmatmul.mubr.msk.f32.vlgmr.msra.gmra.mrb[6].mxu1 %vm138_vm0, %v1017_v29 }
 0x789   :  { %v3371_v40 = vpop.f32.mrb[6].mxu1 }
 0x78a   :  { %v1096_v41 = vadd.f32 1e-05, %v3371_v40  ;;  %v1090_v47 = vpop.f32.mrb[7].mxu1 }
 0x78b   :  { %v1091_v48 = vadd.f32 1e-05, %v1090_v47 }
 0x78c   :  { %3915 = vrsqrt.f32 %v1096_v41 }
 0x78d   :  { %3917 = vrsqrt.f32 %v1091_v48 }
 0x796   :  { %v3916_v54 = vpop.eup %3915 }
 0x797   :  { %v3918_v1 = vpop.eup %3917  ;;  %v1102_v2 = vmul.f32 %v3916_v54, %v1015_v25  ;;  %v1228_v25 = vld [vmem:[%s4880_s12 + $0x28] sm:$0xff] }
 0x798   :  { %v1101_v4 = vmul.f32 %v3918_v1, %v1014_v53  ;;  %v3737_v51 = vpack.c.bf16 %v1228_v25, %v1227_v24  ;;  %v1229_v53 = vld [vmem:[%s4880_s12 + $0x30] sm:$0xff]  ;;  %v2933_v24 = vld [vmem:[%s4873_s5 + $0x20] sm:$0xff]  ;;  %v2934_v25 = vld [vmem:[%s4873_s5 + $0x28] sm:$0xff] }
 0x799   :  { %v1110_v10 = vmul.f32 %v2919_v55, %v1102_v2  ;;  %v3741_v29 = vpack.c.bf16 %v1230_v28, %v1229_v53  ;;  %v3761_v53 = vpack.c.bf16 %v2934_v25, %v2933_v24  ;;  %v2940_v28 = vld [vmem:[%s4874_s6 + $0x28] sm:$0xff]  ;;  %v2948_v24 = vld [vmem:[%s4875_s7 + $0x58] sm:$0xff] }
 0x79a   :  { %v1109_v11 = vmul.f32 %v2919_v55, %v1101_v4 }
 0x79b   :  { %v1118_v13 = vadd.f32 %v2920_v6, %v1110_v10 }
 0x79c   :  { %v1117_v14 = vadd.f32 %v2920_v6, %v1109_v11  ;;  %v2924_v6 = vld [vmem:[%s4881_s13] ss:$0 sm:$0xff] }
 0x79d   :  { %v4495_v15 = vadd.f32 %v1118_v13, %v4115_v20  ;;  %v1224_v20 = vld [vmem:[%s4880_s12 + $0x8] sm:$0xff] }
 0x79e   :  { %v4492_v60 = vadd.f32 %v1117_v14, %v4076_v5  ;;  %v1223_v5 = vld [vmem:[%s4880_s12] sm:$0xff] }
 0x79f   :  { %v3729_v16 = vpack.c.bf16 %v1224_v20, %v1223_v5 }
 0x7a0   :  { %3380 = vmatprep.mubr.msk.f32.mxu0 %vm138_vm0, %v4492_v60 }
 0x7a1   :  { %3381 = vmatmul.mubr.msk.f32.vlgmr.msra.gmra.mrb[22].mxu0 %vm138_vm0, %v4495_v15  ;;  %3730 = vmatprep.subr.bf16.mxu1 %v3729_v16 }
 0x7a2   :  { %3748 = vmatpush3.bf16.msra.mxu0 %v4448_v7  ;;  %3732 = vmatpush3.bf16.msra.mxu1 %v3729_v16 }
 0x7a3   :  { %3750 = vmatprep.subr.bf16.mxu0 %v4460_v12  ;;  %3734 = vmatprep.subr.bf16.mxu1 %v3733_v23 }
 0x7a6   :  { %3752 = vmatpush3.bf16.msra.mxu0 %v4460_v12  ;;  %3736 = vmatpush3.bf16.msra.mxu1 %v3733_v23 }
 0x7a7   :  { %3754 = vmatprep.subr.bf16.mxu0 %v4448_v7  ;;  %3738 = vmatprep.subr.bf16.mxu1 %v3737_v51 }
 0x7aa   :  { %3740 = vmatpush3.bf16.msra.mxu1 %v3737_v51  ;;  %v2939_v51 = vld [vmem:[%s4874_s6 + $0x20] sm:$0xff] }
 0x7ab   :  { %3742 = vmatprep.subr.bf16.mxu1 %v3741_v29 }
 0x7ae   :  { %3744 = vmatpush3.bf16.msra.mxu1 %v3741_v29  ;;  %v2935_v29 = vld [vmem:[%s4873_s5 + $0x30] sm:$0xff] }
 0x7af   :  { %3762 = vmatprep.subr.bf16.mxu1 %v3761_v53 }
 0x874   :  { %v3382_v31 = vpop.f32.mrb[22].mxu0 }
 0x875   :  { %v1210_v32 = vadd.f32 %v3382_v31, %v2921_v30  ;;  %v1204_v36 = vpop.f32.mrb[23].mxu0  ;;  %v3769_v31 = vpack.c.bf16 %v2940_v28, %v2939_v51  ;;  %v2949_v51 = vld [vmem:[%s4875_s7 + $0x60] sm:$0xff]  ;;  %v2952_v28 = vld [vmem:[%s4875_s7 + $0x78] sm:$0xff] }
 0x876   :  { %v1205_v38 = vadd.f32 %v2921_v30, %v1204_v36  ;;  %v2936_v30 = vld [vmem:[%s4873_s5 + $0x38] sm:$0xff]  ;;  %v2941_v36 = vld [vmem:[%s4874_s6 + $0x30] sm:$0xff] }
 0x877   :  { %v1216_v39 = vmul.f32 0.70710677, %v1210_v32  ;;  %v1214_v1 = vmul.f32 0.5, %v1210_v32  ;;  %v3765_v32 = vpack.c.bf16 %v2936_v30, %v2935_v29 }
 0x878   :  { %v1215_v40 = vmul.f32 0.70710677, %v1205_v38  ;;  %v1213_v54 = vmul.f32 0.5, %v1205_v38  ;;  %v2942_v38 = vld [vmem:[%s4874_s6 + $0x38] sm:$0xff] }
 0x879   :  { %3919 = verf.f32 %v1216_v39  ;;  %v3773_v39 = vpack.c.bf16 %v2942_v38, %v2941_v36 }
 0x87a   :  { %3921 = verf.f32 %v1215_v40  ;;  %v2945_v40 = vld [vmem:[%s4875_s7 + $0x40] sm:$0xff] }
 0x883   :  { %v3920_v41 = vpop.eup %3919 }
 0x884   :  { %v3922_v47 = vpop.eup %3921  ;;  %v1220_v48 = vadd.f32 1.0, %v3920_v41  ;;  %v2946_v41 = vld [vmem:[%s4875_s7 + $0x48] sm:$0xff] }
 0x885   :  { %v1219_v55 = vadd.f32 1.0, %v3922_v47  ;;  %v3777_v47 = vpack.c.bf16 %v2946_v41, %v2945_v40 }
 0x886   :  { %v1222_v4 = vmul.f32 %v1220_v48, %v1214_v1 }
 0x887   :  { %v1221_v2 = vmul.f32 %v1219_v55, %v1213_v54 }
 0x889   :  { %3399 = vmatprep.mubr.msk.f32.mxu1 %vm313_vm1, %v1221_v2 }
 0x88a   :  { %3400 = vmatmul.mubr.msk.f32.vlgmr.msra.gmra.mrb[8].mxu1 %vm313_vm1, %v1222_v4  ;;  %v2931_v4 = vld [vmem:[%s4882_s14] ss:$0 sm:$0xff] }
 0x88b   :  { %3764 = vmatpush3.bf16.msra.mxu1 %v3761_v53  ;;  %v2950_v53 = vld [vmem:[%s4875_s7 + $0x68] sm:$0xff] }
 0x88c   :  { %3766 = vmatprep.subr.bf16.mxu1 %v3765_v32 }
 0x88f   :  { %3768 = vmatpush3.bf16.msra.mxu1 %v3765_v32 }
 0x890   :  { %3778 = vmatprep.subr.bf16.mxu1 %v3777_v47 }
 0x95d   :  { %v3401_v10 = vpop.f32.mrb[8].mxu1 }
 0x95e   :  { %v1310_v11 = vpop.f32.mrb[9].mxu1  ;;  %v1316_v14 = vadd.f32 %v3401_v10, %v2924_v6 }
 0x95f   :  { %v1311_v13 = vadd.f32 %v2924_v6, %v1310_v11 }
 0x961   :  { %3410 = vmatprep.mubr.msk.f32.mxu0 %vm138_vm0, %v1311_v13 }
 0x962   :  { %3411 = vmatmul.mubr.msk.f32.vlgmr.msra.gmra.mrb[24].mxu0 %vm138_vm0, %v1316_v14 }
 0x963   :  { %3756 = vmatpush3.bf16.msra.mxu0 %v4448_v7 }
 0x964   :  { %3758 = vmatprep.subr.bf16.mxu0 %v4460_v12 }
 0x967   :  { %3760 = vmatpush3.bf16.msra.mxu0 %v4460_v12 }
 0x968   :  { %3770 = vmatprep.subr.bf16.mxu0 %v3769_v31 }
 0xa35   :  { %v3412_v5 = vpop.f32.mrb[24].mxu0 }
 0xa36   :  { %v1403_v20 = vsub.f32 %v1316_v14, %v3412_v5  ;;  %v1393_v16 = vpop.f32.mrb[25].mxu0 }
 0xa37   :  { %v1402_v17 = vsub.f32 %v1311_v13, %v1393_v16  ;;  %v2932_v13 = vld [vmem:[%s4883_s15] ss:$0 sm:$0xff] }
 0xa38   :  { %v1405_v23 = vmul.f32 %v1403_v20, %v1403_v20 }
 0xa39   :  { %v1404_v18 = vmul.f32 %v1402_v17, %v1402_v17 }
 0xa3b   :  { %3421 = vmatprep.mubr.msk.f32.mxu0 %vm138_vm0, %v1404_v18 }
 0xa3c   :  { %3422 = vmatmul.mubr.msk.f32.vlgmr.msra.gmra.mrb[26].mxu0 %vm138_vm0, %v1405_v23  ;;  %v2947_v23 = vld [vmem:[%s4875_s7 + $0x50] sm:$0xff] }
 0xa3d   :  { %3772 = vmatpush3.bf16.msra.mxu0 %v3769_v31 }
 0xa3e   :  { %3774 = vmatprep.subr.bf16.mxu0 %v3773_v39 }
 0xa41   :  { %3776 = vmatpush3.bf16.msra.mxu0 %v3773_v39 }
 0xa42   :  { %3794 = vmatprep.subr.bf16.mxu0 %v4117_v21 }
 0xb0f   :  { %v3423_v48 = vpop.f32.mrb[26].mxu0 }
 0xb10   :  { %v1484_v54 = vadd.f32 1e-05, %v3423_v48  ;;  %v1478_v55 = vpop.f32.mrb[27].mxu0 }
 0xb11   :  { %v1479_v1 = vadd.f32 1e-05, %v1478_v55 }
 0xb12   :  { %3923 = vrsqrt.f32 %v1484_v54 }
 0xb13   :  { %3925 = vrsqrt.f32 %v1479_v1 }
 0xb1c   :  { %v3924_v2 = vpop.eup %3923 }
 0xb1d   :  { %v3926_v6 = vpop.eup %3925  ;;  %v1490_v10 = vmul.f32 %v3924_v2, %v1403_v20 }
 0xb1e   :  { %v1489_v11 = vmul.f32 %v3926_v6, %v1402_v17  ;;  %v3781_v17 = vpack.c.bf16 %v2948_v24, %v2947_v23 }
 0xb1f   :  { %v1498_v14 = vmul.f32 %v2931_v4, %v1490_v10 }
 0xb20   :  { %v1497_v5 = vmul.f32 %v2931_v4, %v1489_v11 }
 0xb21   :  { %v1506_v16 = vadd.f32 %v2932_v13, %v1498_v14 }
 0xb22   :  { %v1505_v18 = vadd.f32 %v2932_v13, %v1497_v5 }
 0xb23   :  { %v4591_v20 = vadd.f32 %v1506_v16, %v4495_v15  ;;  %v2951_v15 = vld [vmem:[%s4875_s7 + $0x70] sm:$0xff] }
 0xb24   :  { %v4588_v25 = vadd.f32 %v1505_v18, %v4492_v60  ;;  %v3785_v60 = vpack.c.bf16 %v2950_v53, %v2949_v51  ;;  %v3789_v29 = vpack.c.bf16 %v2952_v28, %v2951_v15 }
 0xb26   :  { %3432 = vmatprep.mubr.msk.f32.mxu1 %vm138_vm0, %v4588_v25  ;;  %3443 = vmatprep.mubr.msk.f32.mxu0 %vm138_vm0, %v4588_v25 }
 0xb27   :  { %3433 = vmatmul.mubr.msk.f32.vlgmr.msra.gmra.mrb[10].mxu1 %vm138_vm0, %v4591_v20  ;;  %3444 = vmatmul.mubr.msk.f32.vlgmr.msra.gmra.mrb[28].mxu0 %vm138_vm0, %v4591_v20 }
 0xb28   :  { %3780 = vmatpush3.bf16.msra.mxu1 %v3777_v47  ;;  %3796 = vmatpush3.bf16.msra.mxu0 %v4117_v21 }
 0xb29   :  { %3782 = vmatprep.subr.bf16.mxu1 %v3781_v17  ;;  %3798 = vmatprep.subr.bf16.mxu0 %v4134_v27 }
 0xb2c   :  { %3784 = vmatpush3.bf16.msra.mxu1 %v3781_v17  ;;  %3800 = vmatpush3.bf16.msra.mxu0 %v4134_v27 }
 0xb2d   :  { %3786 = vmatprep.subr.bf16.mxu1 %v3785_v60  ;;  %3802 = vmatprep.subr.bf16.mxu0 %v4152_v33 }
 0xb30   :  { %3788 = vmatpush3.bf16.msra.mxu1 %v3785_v60  ;;  %3804 = vmatpush3.bf16.msra.mxu0 %v4152_v33 }
 0xb31   :  { %3790 = vmatprep.subr.bf16.mxu1 %v3789_v29  ;;  %3806 = vmatprep.subr.bf16.mxu0 %v4163_v37 }
 0xb34   :  { %3792 = vmatpush3.bf16.msra.mxu1 %v3789_v29  ;;  %3808 = vmatpush3.bf16.msra.mxu0 %v4163_v37 }
 0xbfa   :  { %v3434_v21 = vpop.f32.mrb[10].mxu1  ;;  %v3445_v30 = vpop.f32.mrb[28].mxu0 }
 0xbfb   :  { %v1672_v31 = vadd.f32 %v3445_v30, %v4174_v43  ;;  %v1586_v32 = vpop.f32.mrb[11].mxu1  ;;  %v1666_v36 = vpop.f32.mrb[29].mxu0  ;;  %v1766_v39 = vmul.f32 %v3434_v21, %v3434_v21 }
 0xbfc   :  { %v1765_v27 = vmul.f32 %v1586_v32, %v1586_v32  ;;  %v1667_v38 = vadd.f32 %v4174_v43, %v1666_v36  ;;  %3462 = vmatprep.mubr.msk.f32.mxu1 %vm313_vm1, %v1586_v32 }
 0xbfd   :  { %3463 = vmatmul.mubr.msk.f32.vlgmr.msra.gmra.mrb[12].mxu1 %vm313_vm1, %v3434_v21 }
 0xbfe   :  { %v3809_v33 = vpack.c.bf16 %v1672_v31, %v1667_v38  ;;  %3481 = vmatprep.mubr.msk.f32.mxu0 %vm313_vm1, %v1765_v27 }
 0xbff   :  { %3482 = vmatmul.mubr.msk.f32.vlgmr.msra.gmra.mrb[30].mxu0 %vm313_vm1, %v1766_v39 }
 0xc00   :  { %3810 = vmatprep.subr.bf16.mxu1 %v3809_v33 }
 0xc01   :  { %3812 = vmatpush3.bf16.msra.mxu1 %v3809_v33 }
 0xc02   :  { %3846 = vmatprep.subr.bf16.mxu1 %v4448_v7 }
 0xcd0   :  { %v4627_v37 = vpop.f32.mrb[12].mxu1 }
 0xcd1   :  { %v4629_v40 = vpop.f32.mrb[13].mxu1  ;;  %v1849_v13 = vsel %vm89_vm5, %v4627_v37, -inf  ;;  %v1855_v14 = vsel %vm4213_vm11, %v4627_v37, -inf  ;;  %v1863_v5 = vsel %vm4182_vm4, %v4627_v37, -inf  ;;  %v1871_v16 = vsel %vm4205_vm10, %v4627_v37, -inf }
 0xcd2   :  { %v4631_v41 = vpop.f32.mrb[30].mxu0  ;;  %v1854_v43 = vsel %vm4213_vm11, %v4629_v40, -inf  ;;  %v1848_v47 = vsel %vm89_vm5, %v4629_v40, -inf  ;;  %v1862_v1 = vsel %vm4182_vm4, %v4629_v40, -inf  ;;  %v1870_v2 = vsel %vm4205_vm10, %v4629_v40, -inf }
 0xcd3   :  { %v1933_v48 = vsub.f32 %v4627_v37, %v4631_v41  ;;  %v1839_v54 = vpop.f32.mrb[31].mxu0  ;;  %1856 = vmax.xlane.f32.xlu1 %v1854_v43  ;;  %1850 = vmax.xlane.f32.xlu0 %v1848_v47  ;;  %v1878_v4 = vsel %vm4235_vm3, %v4629_v40, -inf  ;;  %v1886_v6 = vsel %vm4229_vm2, %v4629_v40, -inf  ;;  %v1894_v10 = vsel %vm4248_vm12, %v4629_v40, -inf }
 0xcd4   :  { %v1932_v55 = vsub.f32 %v4629_v40, %v1839_v54  ;;  %v1902_v11 = vsel %vm109_vm9, %v4629_v40, -inf  ;;  %v1879_v18 = vsel %vm4235_vm3, %v4627_v37, -inf  ;;  %v1887_v23 = vsel %vm4229_vm2, %v4627_v37, -inf }
 0xcd5   :  { %v1895_v24 = vsel %vm4248_vm12, %v4627_v37, -inf  ;;  %v1903_v17 = vsel %vm109_vm9, %v4627_v37, -inf }
 0xcd7   :  { %1864 = vmax.xlane.f32.xlu0 %v1862_v1 }
 0xcdb   :  { %1872 = vmax.xlane.f32.xlu0 %v1870_v2 }
 0xcdf   :  { %1880 = vmax.xlane.f32.xlu0 %v1878_v4 }
 0xce3   :  { %1888 = vmax.xlane.f32.xlu0 %v1886_v6 }
 0xce7   :  { %1896 = vmax.xlane.f32.xlu0 %v1894_v10 }
 0xceb   :  { %1904 = vmax.xlane.f32.xlu0 %v1902_v11 }
 0xcef   :  { %1852 = vmax.xlane.f32.xlu0 %v1849_v13 }
 0xcf3   :  { %1858 = vmax.xlane.f32.xlu0 %v1855_v14 }
 0xcf7   :  { %1866 = vmax.xlane.f32.xlu0 %v1863_v5 }
 0xcfb   :  { %1874 = vmax.xlane.f32.xlu0 %v1871_v16 }
 0xcff   :  { %1882 = vmax.xlane.f32.xlu0 %v1879_v18 }
 0xd03   :  { %1890 = vmax.xlane.f32.xlu0 %v1887_v23 }
 0xd07   :  { %1898 = vmax.xlane.f32.xlu0 %v1895_v24 }
 0xd0b   :  { %1906 = vmax.xlane.f32.xlu0 %v1903_v17 }
 0xd60   :  { %v1851_v51 = vpop.xlane.xlu0 %1850  ;;  %v1857_v28 = vpop.xlane.xlu1 %1856 }
 0xd61   :  { %v1860_v21 = vsel %vm4213_vm11, %v1857_v28, %v1851_v51 }
 0xd64   :  { %v1865_v53 = vpop.xlane.xlu0 %1864 }
 0xd65   :  { %v1868_v30 = vsel %vm4182_vm4, %v1865_v53, %v1860_v21 }
 0xd68   :  { %v1873_v60 = vpop.xlane.xlu0 %1872 }
 0xd69   :  { %v1876_v32 = vsel %vm4205_vm10, %v1873_v60, %v1868_v30 }
 0xd6c   :  { %v1881_v15 = vpop.xlane.xlu0 %1880 }
 0xd6d   :  { %v1884_v36 = vsel %vm4235_vm3, %v1881_v15, %v1876_v32 }
 0xd70   :  { %v1889_v29 = vpop.xlane.xlu0 %1888 }
 0xd71   :  { %v1892_v27 = vsel %vm4229_vm2, %v1889_v29, %v1884_v36 }
 0xd74   :  { %v1897_v31 = vpop.xlane.xlu0 %1896 }
 0xd75   :  { %v1900_v38 = vsel %vm4248_vm12, %v1897_v31, %v1892_v27 }
 0xd78   :  { %v1905_v39 = vpop.xlane.xlu0 %1904 }
 0xd79   :  { %v1908_v33 = vsel %vm109_vm9, %v1905_v39, %v1900_v38 }
 0xd7a   :  { %v1913_v40 = vrot.slane %v1908_v33, 4 }
 0xd7c   :  { %v1914_v43 = vmax.f32 %v1908_v33, %v1913_v40  ;;  %v1853_v47 = vpop.xlane.xlu0 %1852 }
 0xd7e   :  { %v1915_v54 = vrot.slane %v1914_v43, 2 }
 0xd80   :  { %v1916_v1 = vmax.f32 %v1914_v43, %v1915_v54  ;;  %v1859_v2 = vpop.xlane.xlu0 %1858 }
 0xd81   :  { %v1861_v24 = vsel %vm4213_vm11, %v1859_v2, %v1853_v47 }
 0xd82   :  { %v1917_v4 = vrot.slane %v1916_v1, 1 }
 0xd84   :  { %v1918_v6 = vmax.f32 %v1916_v1, %v1917_v4  ;;  %v1867_v10 = vpop.xlane.xlu0 %1866 }
 0xd85   :  { %v1869_v17 = vsel %vm4182_vm4, %v1867_v10, %v1861_v24 }
 0xd86   :  { %v1930_v11 = vsel %vm98_vm7, %v1908_v33, %v1918_v6 }
 0xd87   :  { %v1934_v13 = vsub.f32 %v1932_v55, %v1930_v11 }
 0xd88   :  { %v1875_v14 = vpop.xlane.xlu0 %1874 }
 0xd89   :  { %v1936_v5 = vadd.f32 -1.3862944, %v1934_v13  ;;  %v1877_v53 = vsel %vm4205_vm10, %v1875_v14, %v1869_v17 }
 0xd8b   :  { %v1938_v16 = vmul.f32 1.442695, %v1936_v5 }
 0xd8c   :  { %v1883_v18 = vpop.xlane.xlu0 %1882 }
 0xd8d   :  { %3927 = vpow2.f32 %v1938_v16  ;;  %v1885_v60 = vsel %vm4235_vm3, %v1883_v18, %v1877_v53 }
 0xd90   :  { %v1891_v23 = vpop.xlane.xlu0 %1890 }
 0xd91   :  { %v1893_v15 = vsel %vm4229_vm2, %v1891_v23, %v1885_v60 }
 0xd94   :  { %v1899_v51 = vpop.xlane.xlu0 %1898 }
 0xd95   :  { %v1901_v28 = vsel %vm4248_vm12, %v1899_v51, %v1893_v15 }
 0xd97   :  { %v3928_v55 = vpop.eup %3927 }
 0xd98   :  { %v1907_v29 = vpop.xlane.xlu0 %1906  ;;  %v1942_v59 = vadd.f32 2.5e-05, %v3928_v55 }
 0xd99   :  { %v1909_v50 = vsel %vm109_vm9, %v1907_v29, %v1901_v28 }
 0xd9a   :  { %v1922_v21 = vrot.slane %v1909_v50, 4  ;;  %1944 = vrot.lane.b32.xlu0 %v1942_v59, %s3971_s3  ;;  %3544 = vmatprep.mubr.msk.f32.mxu0 %vm98_vm7, %v1942_v59 }
 0xd9c   :  { %v1923_v56 = vmax.f32 %v1909_v50, %v1922_v21 }
 0xd9e   :  { %v1924_v0 = vrot.slane %v1923_v56, 2 }
 0xda0   :  { %v1925_v30 = vmax.f32 %v1923_v56, %v1924_v0 }
 0xda2   :  { %v1926_v31 = vrot.slane %v1925_v30, 1 }
 0xda4   :  { %v1927_v63 = vmax.f32 %v1925_v30, %v1926_v31 }
 0xda6   :  { %v1931_v3 = vsel %vm98_vm7, %v1909_v50, %v1927_v63 }
 0xda7   :  { %v1935_v32 = vsub.f32 %v1933_v48, %v1931_v3 }
 0xda9   :  { %v1937_v36 = vadd.f32 -1.3862944, %v1935_v32 }
 0xdab   :  { %v1940_v27 = vmul.f32 1.442695, %v1937_v36 }
 0xdad   :  { %3929 = vpow2.f32 %v1940_v27 }
 0xdb7   :  { %v3930_v38 = vpop.eup %3929 }
 0xdb8   :  { %v1943_v39 = vadd.f32 2.5e-05, %v3930_v38 }
 0xdba   :  { %1946 = vrot.lane.b32.xlu1 %v1943_v39, %s3971_s3  ;;  %v1953_v43 = vsel %vm100_vm14, %v1943_v39, 0.0 }
 0xe0c   :  { %v1945_v33 = vpop.permute.xlu0 %1944 }
 0xe0d   :  { %v1954_v40 = vsel %vm98_vm7, %v1945_v33, 0.0 }
 0xe0e   :  { %1956 = vxpose.xlu0.b32.start [1/2] (short) %v1954_v40, 128 }
 0xe12   :  { %1957 = vxpose.xlu0.b32.end [2/2] (short) %v1953_v43, 128 }
 0xe8e   :  { %v1972_v47 = vpop.trf.xlu0 }
 0xe8f   :  { %3488 = vmatprep.mubr.msk.f32.mxu1 %vm634_vm13, %v1972_v47 }
 0xe92   :  { %v1973_v37 = vpop.trf.xlu0 }
 0xe93   :  { %3489 = vmatmul.mubr.msk.f32.vlgmr.msra.gmra.mrb[14].mxu1 %vm634_vm13, %v1973_v37 }
 0xe94   :  { %3848 = vmatpush3.bf16.msra.mxu1 %v4448_v7 }
 0xe95   :  { %3850 = vmatprep.subr.bf16.mxu1 %v4460_v12 }
 0xe96   :  { %v1974_v41 = vpop.trf.xlu0 }
 0xe97   :  { %3491 = vmatprep.mubr.msk.f32.mxu1 %vm634_vm13, %v1974_v41 }
 0xe98   :  { %3852 = vmatpush3.bf16.msra.mxu1 %v4460_v12 }
 0xe9a   :  { %v1975_v48 = vpop.trf.xlu0 }
 0xe9b   :  { %3492 = vmatmul.mubr.msk.f32.gmra.mrb[16].mxu1 %vm634_vm13, %v1975_v48 }
 0xe9e   :  { %v1976_v54 = vpop.trf.xlu0 }
 0xe9f   :  { %3494 = vmatprep.mubr.msk.f32.mxu1 %vm634_vm13, %v1976_v54 }
 0xea2   :  { %v1977_v1 = vpop.trf.xlu0 }
 0xea3   :  { %3495 = vmatmul.mubr.msk.f32.gmra.mrb[18].mxu1 %vm634_vm13, %v1977_v1 }
 0xea6   :  { %v1978_v2 = vpop.trf.xlu0 }
 0xea7   :  { %3497 = vmatprep.mubr.msk.f32.mxu1 %vm634_vm13, %v1978_v2 }
 0xeaa   :  { %v1979_v4 = vpop.trf.xlu0 }
 0xeab   :  { %3498 = vmatmul.mubr.msk.f32.gmra.mrb[20].mxu1 %vm634_vm13, %v1979_v4 }
 0xeae   :  { %v1980_v6 = vpop.trf.xlu0 }
 0xeaf   :  { %3500 = vmatprep.mubr.msk.f32.mxu1 %vm634_vm13, %v1980_v6 }
 0xeb2   :  { %v1981_v10 = vpop.trf.xlu0 }
 0xeb3   :  { %3501 = vmatmul.mubr.msk.f32.gmra.mrb[22].mxu1 %vm634_vm13, %v1981_v10 }
 0xeb6   :  { %v1982_v11 = vpop.trf.xlu0 }
 0xeb7   :  { %3503 = vmatprep.mubr.msk.f32.mxu1 %vm634_vm13, %v1982_v11 }
 0xeba   :  { %v1983_v13 = vpop.trf.xlu0 }
 0xebb   :  { %3504 = vmatmul.mubr.msk.f32.gmra.mrb[24].mxu1 %vm634_vm13, %v1983_v13  ;;  %v2983_v13 = vld [vmem:[%s4878_s10 + $0x20] sm:$0xff] }
 0xebe   :  { %v1984_v14 = vpop.trf.xlu0 }
 0xebf   :  { %3506 = vmatprep.mubr.msk.f32.mxu1 %vm634_vm13, %v1984_v14  ;;  %v2984_v14 = vld [vmem:[%s4878_s10 + $0x28] sm:$0xff] }
 0xec2   :  { %v1985_v5 = vpop.trf.xlu0 }
 0xec3   :  { %3507 = vmatmul.mubr.msk.f32.gmra.mrb[26].mxu1 %vm634_vm13, %v1985_v5  ;;  %v2985_v5 = vld [vmem:[%s4878_s10 + $0x30] sm:$0xff] }
 0xec6   :  { %v1986_v16 = vpop.trf.xlu0 }
 0xec7   :  { %3509 = vmatprep.mubr.msk.f32.mxu1 %vm634_vm13, %v1986_v16  ;;  %v3861_v16 = vpack.c.bf16 %v2984_v14, %v2983_v13 }
 0xec9   :  { %3862 = vmatprep.subr.bf16.mxu1 %v3861_v16 }
 0xeca   :  { %v1987_v18 = vpop.trf.xlu0 }
 0xecb   :  { %3510 = vmatmul.mubr.msk.f32.gmra.mrb[28].mxu1 %vm634_vm13, %v1987_v18  ;;  %v2986_v18 = vld [vmem:[%s4878_s10 + $0x38] sm:$0xff] }
 0xf66   :  { %v3490_v23 = vpop.f32.mrb[14].mxu1 }
 0xf67   :  { %v2182_v24 = vmul.f32 %v3490_v23, %v4347_v44  ;;  %v2102_v17 = vpop.f32.mrb[15].mxu1  ;;  %v3865_v23 = vpack.c.bf16 %v2986_v18, %v2985_v5 }
 0xf68   :  { %v2181_v51 = vmul.f32 %v2102_v17, %v4352_v45 }
 0xf6a   :  { %v3813_v53 = vpack.c.bf16 %v2182_v24, %v2181_v51 }
 0xf6c   :  { %3814 = vmatprep.subr.bf16.mxu0 %v3813_v53 }
 0xf6d   :  { %3816 = vmatpush3.bf16.msra.mxu0 %v3813_v53 }
 0xf6e   :  { %v3493_v60 = vpop.f32.mrb[16].mxu1 }
 0xf6f   :  { %v2184_v55 = vmul.f32 %v3493_v60, %v4359_v61  ;;  %v2112_v15 = vpop.f32.mrb[17].mxu1 }
 0xf70   :  { %v2183_v28 = vmul.f32 %v2112_v15, %v4364_v62 }
 0xf72   :  { %v3817_v29 = vpack.c.bf16 %v2184_v55, %v2183_v28  ;;  %v2981_v55 = vld [vmem:[%s4876_s8 + $0x1] ss:$0 sm:$0xff] }
 0xf74   :  { %3818 = vmatprep.subr.bf16.mxu0 %v3817_v29 }
 0xf75   :  { %3820 = vmatpush3.bf16.msra.mxu0 %v3817_v29 }
 0xf76   :  { %v3496_v59 = vpop.f32.mrb[18].mxu1 }
 0xf77   :  { %v2186_v50 = vmul.f32 %v3496_v59, %v4371_v8  ;;  %v2122_v21 = vpop.f32.mrb[19].mxu1  ;;  %v2982_v59 = vld [vmem:[%s4877_s9 + $0x1] ss:$0 sm:$0xff] }
 0xf78   :  { %v2185_v44 = vmul.f32 %v2122_v21, %v4376_v9 }
 0xf7a   :  { %v3821_v56 = vpack.c.bf16 %v2186_v50, %v2185_v44 }
 0xf7c   :  { %3822 = vmatprep.subr.bf16.mxu0 %v3821_v56 }
 0xf7d   :  { %3824 = vmatpush3.bf16.msra.mxu0 %v3821_v56 }
 0xf7e   :  { %v3499_v45 = vpop.f32.mrb[20].mxu1 }
 0xf7f   :  { %v2188_v0 = vmul.f32 %v3499_v45, %v4383_v52  ;;  %v2132_v30 = vpop.f32.mrb[21].mxu1 }
 0xf80   :  { %v2187_v61 = vmul.f32 %v2132_v30, %v4388_v58 }
 0xf82   :  { %v3825_v31 = vpack.c.bf16 %v2188_v0, %v2187_v61  ;;  %v2993_v61 = vld [vmem:[%s4880_s12 + $0x50] sm:$0xff] }
 0xf84   :  { %3826 = vmatprep.subr.bf16.mxu0 %v3825_v31 }
 0xf85   :  { %3828 = vmatpush3.bf16.msra.mxu0 %v3825_v31  ;;  %v2994_v31 = vld [vmem:[%s4880_s12 + $0x58] sm:$0xff] }
 0xf86   :  { %v3502_v62 = vpop.f32.mrb[22].mxu1 }
 0xf87   :  { %v2190_v63 = vmul.f32 %v3502_v62, %v4395_v19  ;;  %v2142_v3 = vpop.f32.mrb[23].mxu1  ;;  %v3873_v62 = vpack.c.bf16 %v2994_v31, %v2993_v61 }
 0xf88   :  { %v2189_v8 = vmul.f32 %v2142_v3, %v4400_v22  ;;  %v2996_v3 = vld [vmem:[%s4880_s12 + $0x68] sm:$0xff] }
 0xf8a   :  { %v3829_v32 = vpack.c.bf16 %v2190_v63, %v2189_v8  ;;  %v2995_v63 = vld [vmem:[%s4880_s12 + $0x60] sm:$0xff] }
 0xf8b   :  { %v3877_v8 = vpack.c.bf16 %v2996_v3, %v2995_v63 }
 0xf8c   :  { %3830 = vmatprep.subr.bf16.mxu0 %v3829_v32 }
 0xf8d   :  { %3832 = vmatpush3.bf16.msra.mxu0 %v3829_v32  ;;  %v2997_v32 = vld [vmem:[%s4880_s12 + $0x70] sm:$0xff] }
 0xf8e   :  { %v3505_v9 = vpop.f32.mrb[24].mxu1 }
 0xf8f   :  { %v2192_v36 = vmul.f32 %v3505_v9, %v4407_v57  ;;  %v2152_v27 = vpop.f32.mrb[25].mxu1  ;;  %v2998_v9 = vld [vmem:[%s4880_s12 + $0x78] sm:$0xff] }
 0xf90   :  { %v2191_v52 = vmul.f32 %v2152_v27, %v4412_v26  ;;  %v1947_v26 = vpop.permute.xlu1 %1946  ;;  %v2988_v27 = vld [vmem:[%s4879_s11 + $0x1] ss:$0 sm:$0xff] }
 0xf92   :  { %v3833_v38 = vpack.c.bf16 %v2192_v36, %v2191_v52  ;;  %v3881_v36 = vpack.c.bf16 %v2998_v9, %v2997_v32 }
 0xf94   :  { %3834 = vmatprep.subr.bf16.mxu0 %v3833_v38 }
 0xf95   :  { %3836 = vmatpush3.bf16.msra.mxu0 %v3833_v38 }
 0xf96   :  { %v3508_v58 = vpop.f32.mrb[26].mxu1 }
 0xf97   :  { %v2194_v39 = vmul.f32 %v3508_v58, %v4419_v34  ;;  %v2162_v33 = vpop.f32.mrb[27].mxu1 }
 0xf98   :  { %v2193_v19 = vmul.f32 %v2162_v33, %v4424_v35 }
 0xf9a   :  { %v3837_v40 = vpack.c.bf16 %v2194_v39, %v2193_v19 }
 0xf9c   :  { %3838 = vmatprep.subr.bf16.mxu0 %v3837_v40 }
 0xf9d   :  { %3840 = vmatpush3.bf16.msra.mxu0 %v3837_v40 }
 0xf9e   :  { %v3511_v22 = vpop.f32.mrb[28].mxu1 }
 0xf9f   :  { %v2196_v43 = vmul.f32 %v3511_v22, %v4431_v42  ;;  %v2172_v47 = vpop.f32.mrb[29].mxu1 }
 0xfa0   :  { %v2195_v57 = vmul.f32 %v2172_v47, %v4436_v46 }
 0xfa2   :  { %v3841_v37 = vpack.c.bf16 %v2196_v43, %v2195_v57 }
 0xfa4   :  { %3842 = vmatprep.subr.bf16.mxu0 %v3841_v37 }
 0xfa5   :  { %3844 = vmatpush3.bf16.msra.mxu0 %v3841_v37 }
 0xfa6   :  { %3854 = vmatprep.subr.bf16.mxu0 %v4448_v7 }
 0xfa8   :  { %3545 = vmatmul.mubr.msk.f32.vlgmr.msra.gmra.mrb[32].mxu0 %vm100_vm14, %v1947_v26 }
 0xfa9   :  { %3856 = vmatpush3.bf16.msra.mxu0 %v4448_v7 }
 0xfaa   :  { %3858 = vmatprep.subr.bf16.mxu0 %v4460_v12 }
 0xfad   :  { %3860 = vmatpush3.bf16.msra.mxu0 %v4460_v12 }
0x107b   :  { %v3546_v34 = vpop.f32.mrb[32].mxu0 }
0x107c   :  { %v2263_v35 = vpop.f32.mrb[33].mxu0 }
0x107d   :  { %2274 = vrot.lane.b32.xlu1 %v2263_v35, %s3972_s23 }
0x1081   :  { %2276 = vrot.lane.b32.xlu1 %v3546_v34, %s3972_s23 }
0x10ef   :  { %v2275_v42 = vpop.permute.xlu1 %2274 }
0x10f0   :  { %3931 = vrcp.f32 %v2275_v42 }
0x10f3   :  { %v2277_v46 = vpop.permute.xlu1 %2276 }
0x10f4   :  { %3933 = vrcp.f32 %v2277_v46 }
0x10fa   :  { %v3932_v41 = vpop.eup %3931 }
0x10fb   :  { %v2281_v48 = vmul.f32 %v3932_v41, %v2263_v35  ;;  %v3000_v35 = vld [vmem:[%s4881_s13 + $0x1] ss:$0 sm:$0xff] }
0x10fd   :  { %3555 = vmatprep.mubr.msk.f32.mxu1 %vm138_vm0, %v2281_v48 }
0x10fe   :  { %v3934_v49 = vpop.eup %3933 }
0x10ff   :  { %v2283_v54 = vmul.f32 %v3934_v49, %v3546_v34 }
0x1101   :  { %3556 = vmatmul.mubr.msk.f32.vlgmr.msra.gmra.mrb[30].mxu1 %vm138_vm0, %v2283_v54 }
0x1102   :  { %3864 = vmatpush3.bf16.msra.mxu1 %v3861_v16 }
0x1103   :  { %3866 = vmatprep.subr.bf16.mxu1 %v3865_v23 }
0x1106   :  { %3868 = vmatpush3.bf16.msra.mxu1 %v3865_v23  ;;  %v3010_v23 = vld [vmem:[%s4883_s15 + $0x1] ss:$0 sm:$0xff] }
0x1107   :  { %3886 = vmatprep.subr.bf16.mxu1 %v4448_v7 }
0x11d4   :  { %v3557_v1 = vpop.f32.mrb[30].mxu1 }
0x11d5   :  { %v2370_v2 = vsub.f32 %v2283_v54, %v3557_v1  ;;  %v2360_v4 = vpop.f32.mrb[31].mxu1 }
0x11d6   :  { %v2369_v6 = vsub.f32 %v2281_v48, %v2360_v4 }
0x11d7   :  { %v2372_v11 = vmul.f32 %v2370_v2, %v2370_v2 }
0x11d8   :  { %v2371_v10 = vmul.f32 %v2369_v6, %v2369_v6 }
0x11da   :  { %3566 = vmatprep.mubr.msk.f32.mxu0 %vm138_vm0, %v2371_v10 }
0x11db   :  { %3567 = vmatmul.mubr.msk.f32.vlgmr.msra.gmra.mrb[34].mxu0 %vm138_vm0, %v2372_v11 }
0x12ae   :  { %v3568_v24 = vpop.f32.mrb[34].mxu0 }
0x12af   :  { %v2451_v17 = vadd.f32 1e-05, %v3568_v24  ;;  %v2445_v51 = vpop.f32.mrb[35].mxu0 }
0x12b0   :  { %v2446_v53 = vadd.f32 1e-05, %v2445_v51 }
0x12b1   :  { %3935 = vrsqrt.f32 %v2451_v17 }
0x12b2   :  { %3937 = vrsqrt.f32 %v2446_v53 }
0x12bb   :  { %v3936_v60 = vpop.eup %3935 }
0x12bc   :  { %v3938_v15 = vpop.eup %3937  ;;  %v2457_v28 = vmul.f32 %v3936_v60, %v2370_v2 }
0x12bd   :  { %v2456_v29 = vmul.f32 %v3938_v15, %v2369_v6 }
0x12be   :  { %v2465_v50 = vmul.f32 %v2981_v55, %v2457_v28 }
0x12bf   :  { %v2464_v21 = vmul.f32 %v2981_v55, %v2456_v29 }
0x12c0   :  { %v2473_v44 = vadd.f32 %v2982_v59, %v2465_v50 }
0x12c1   :  { %v2472_v56 = vadd.f32 %v2982_v59, %v2464_v21 }
0x12c2   :  { %v4797_v0 = vadd.f32 %v2473_v44, %v4591_v20  ;;  %v2992_v20 = vld [vmem:[%s4880_s12 + $0x48] sm:$0xff] }
0x12c3   :  { %v4794_v45 = vadd.f32 %v2472_v56, %v4588_v25  ;;  %v2991_v25 = vld [vmem:[%s4880_s12 + $0x40] sm:$0xff] }
0x12c4   :  { %v3869_v30 = vpack.c.bf16 %v2992_v20, %v2991_v25 }
0x12c5   :  { %3577 = vmatprep.mubr.msk.f32.mxu1 %vm138_vm0, %v4794_v45 }
0x12c6   :  { %3578 = vmatmul.mubr.msk.f32.vlgmr.msra.gmra.mrb[32].mxu1 %vm138_vm0, %v4797_v0  ;;  %3870 = vmatprep.subr.bf16.mxu0 %v3869_v30 }
0x12c7   :  { %3888 = vmatpush3.bf16.msra.mxu1 %v4448_v7  ;;  %3872 = vmatpush3.bf16.msra.mxu0 %v3869_v30 }
0x12c8   :  { %3890 = vmatprep.subr.bf16.mxu1 %v4460_v12  ;;  %3874 = vmatprep.subr.bf16.mxu0 %v3873_v62 }
0x12cb   :  { %3892 = vmatpush3.bf16.msra.mxu1 %v4460_v12  ;;  %3876 = vmatpush3.bf16.msra.mxu0 %v3873_v62 }
0x12cc   :  { %3894 = vmatprep.subr.bf16.mxu1 %v4448_v7  ;;  %3878 = vmatprep.subr.bf16.mxu0 %v3877_v8 }
0x12cf   :  { %3880 = vmatpush3.bf16.msra.mxu0 %v3877_v8 }
0x12d0   :  { %3882 = vmatprep.subr.bf16.mxu0 %v3881_v36 }
0x12d3   :  { %3884 = vmatpush3.bf16.msra.mxu0 %v3881_v36 }
0x1399   :  { %v3579_v52 = vpop.f32.mrb[32].mxu1 }
0x139a   :  { %v2567_v38 = vadd.f32 %v3579_v52, %v2988_v27  ;;  %v2561_v58 = vpop.f32.mrb[33].mxu1 }
0x139b   :  { %v2562_v39 = vadd.f32 %v2988_v27, %v2561_v58 }
0x139c   :  { %v2573_v33 = vmul.f32 0.70710677, %v2567_v38  ;;  %v2571_v37 = vmul.f32 0.5, %v2567_v38 }
0x139d   :  { %v2572_v19 = vmul.f32 0.70710677, %v2562_v39  ;;  %v2570_v47 = vmul.f32 0.5, %v2562_v39 }
0x139e   :  { %3939 = verf.f32 %v2573_v33 }
0x139f   :  { %3941 = verf.f32 %v2572_v19 }
0x13a8   :  { %v3940_v40 = vpop.eup %3939 }
0x13a9   :  { %v3942_v22 = vpop.eup %3941  ;;  %v2577_v43 = vadd.f32 1.0, %v3940_v40 }
0x13aa   :  { %v2576_v57 = vadd.f32 1.0, %v3942_v22 }
0x13ab   :  { %v2579_v34 = vmul.f32 %v2577_v43, %v2571_v37 }
0x13ac   :  { %v2578_v26 = vmul.f32 %v2576_v57, %v2570_v47 }
0x13ae   :  { %3596 = vmatprep.mubr.msk.f32.mxu0 %vm313_vm1, %v2578_v26 }
0x13af   :  { %3597 = vmatmul.mubr.msk.f32.vlgmr.msra.gmra.mrb[36].mxu0 %vm313_vm1, %v2579_v34 }
0x1482   :  { %v3598_v42 = vpop.f32.mrb[36].mxu0 }
0x1483   :  { %v2669_v46 = vpop.f32.mrb[37].mxu0  ;;  %v2675_v48 = vadd.f32 %v3598_v42, %v3000_v35 }
0x1484   :  { %v2670_v41 = vadd.f32 %v3000_v35, %v2669_v46 }
0x1486   :  { %3607 = vmatprep.mubr.msk.f32.mxu1 %vm138_vm0, %v2670_v41 }
0x1487   :  { %3608 = vmatmul.mubr.msk.f32.vlgmr.msra.gmra.mrb[34].mxu1 %vm138_vm0, %v2675_v48 }
0x1488   :  { %3896 = vmatpush3.bf16.msra.mxu1 %v4448_v7 }
0x1489   :  { %3898 = vmatprep.subr.bf16.mxu1 %v4460_v12 }
0x148c   :  { %3900 = vmatpush3.bf16.msra.mxu1 %v4460_v12  ;;  %v3009_v12 = vld [vmem:[%s4882_s14 + $0x1] ss:$0 sm:$0xff]  ;;  %s3947_s14 = scalar_lea.vmem %s2878_s25, 256 }
0x148d   :  { %p3948_p0 = scmp.ne.s32.totalorder %s2878_s25, %s3947_s14  ;;  %p3953_p2 = scmp.lt.s32.totalorder %s3947_s14, %s3947_s14 }
0x148f   :  { %p3954_p3 = por %p3953_p2, %p3952_p1 }
0x1491   :  { %p3955_p4 = pnand %p3954_p3, %p3948_p0 }
0x155a   :  { %v3609_v49 = vpop.f32.mrb[34].mxu1 }
0x155b   :  { %v2764_v54 = vsub.f32 %v2675_v48, %v3609_v49  ;;  %v2754_v1 = vpop.f32.mrb[35].mxu1 }
0x155c   :  { %v2763_v2 = vsub.f32 %v2670_v41, %v2754_v1 }
0x155d   :  { %v2766_v6 = vmul.f32 %v2764_v54, %v2764_v54 }
0x155e   :  { %v2765_v4 = vmul.f32 %v2763_v2, %v2763_v2 }
0x1560   :  { %3618 = vmatprep.mubr.msk.f32.mxu1 %vm138_vm0, %v2765_v4 }
0x1561   :  { %3619 = vmatmul.mubr.msk.f32.vlgmr.msra.gmra.mrb[36].mxu1 %vm138_vm0, %v2766_v6 }
0x1634   :  { %v3620_v10 = vpop.f32.mrb[36].mxu1 }
0x1635   :  { %v2845_v11 = vadd.f32 1e-05, %v3620_v10  ;;  %v2839_v13 = vpop.f32.mrb[37].mxu1 }
0x1636   :  { %v2840_v14 = vadd.f32 1e-05, %v2839_v13 }
0x1637   :  { %3943 = vrsqrt.f32 %v2845_v11 }
0x1638   :  { %3945 = vrsqrt.f32 %v2840_v14 }
0x1641   :  { %v3944_v7 = vpop.eup %3943 }
0x1642   :  { %v3946_v5 = vpop.eup %3945  ;;  %v2851_v16 = vmul.f32 %v3944_v7, %v2764_v54 }
0x1643   :  { %v2850_v18 = vmul.f32 %v3946_v5, %v2763_v2 }
0x1644   :  { %v2859_v24 = vmul.f32 %v3009_v12, %v2851_v16 }
0x1645   :  { %v2858_v17 = vmul.f32 %v3009_v12, %v2850_v18 }
0x1646   :  { %v2867_v51 = vadd.f32 %v3010_v23, %v2859_v24 }
0x1647   :  { %v2866_v53 = vadd.f32 %v3010_v23, %v2858_v17 }
0x1648   :  { %v2869_v60 = vadd.f32 %v2867_v51, %v4797_v0 }
0x1649   :  { %v2868_v55 = vadd.f32 %v2866_v53, %v4794_v45 }
0x164a   :  { %2871 = vst.msk [vmem:[#allocation2 + $0x8] sm:$0xff] %vm138_vm0, %v2869_v60 }
0x164b   :  { %2870 = vst.msk [vmem:[#allocation2] sm:$0xff] %vm138_vm0, %v2868_v55 }
0x164c   :  { %3958 = shalt.err (!%p3955_p4)
}
0x164d   :  { %s3959_s26 = scalar_lea.hbm %s4884_s16, 256 }
0x164e   :  { %p3960_p5 = scmp.ne.s32.totalorder %s4884_s16, %s3959_s26  ;;  %p3963_p6 = scmp.lt.u32.totalorder %s3959_s26, %s4884_s16 }
0x1650   :  { %p3965_p7 = pnand %p3963_p6, %p3960_p5 }
0x1652   :  { %3968 = shalt.err (!%p3965_p7)
}
0x1653   :  { %s3974_s29 = smov 128   ;;  %s3975_s4 = smov 8  }
0x1654   :  { %2883 = dma.vmem_to_hbm [thread:$0]  %s2878_s25, 256, %s4884_s16, [#allocation3], %s3974_s29, %s3974_s29, %s3975_s4  }
0x1655   :  { %3969 = dma.done.wait [#allocation3], 256  }
0x1656   :  { %3970 = vsyncadd [#allocation3], 4294967040 }
0x1657   :  { %2887 = vsyncpa [#allocation3], 1 }

</bundles_post_ra>
